<compile_context>
chip_gen: v7x
topology: tpu7x:2x2x1
jax: 0.10.0
libtpu: 0.0.40
codegen_flags: <defaults>
</compile_context>

<pallas_src>
import functools

import jax
import jax.numpy as jnp
from jax.experimental import pallas as pl
from jax.experimental.pallas import tpu as pltpu


# Tile targets (bf16 operands, f32 accumulator): per-tile footprint stays ~1-2 MiB with
# double buffering, comfortably inside the default scoped-VMEM limit on v5e/v6e and
# v7x's 64 MiB VMEM.
_TM, _TN, _TK = 256, 512, 512


def _pick_tile(dim, target, align):
    """Largest halving of `target` (>= align) that evenly divides dim, else full dim."""
    t = target
    while t >= align:
        if dim % t == 0:
            return t
        t //= 2
    return dim


# ----------------------------- dense: x @ W + b [+ GELU] -----------------------------

def _dense_kernel(x_ref, w_ref, b_ref, o_ref, acc_ref, *, activation):
    @pl.when(pl.program_id(2) == 0)
    def _():
        acc_ref[...] = jnp.zeros_like(acc_ref)

    acc_ref[...] += jnp.dot(x_ref[...], w_ref[...],
                            preferred_element_type=jnp.float32)

    @pl.when(pl.program_id(2) == pl.num_programs(2) - 1)
    def _():
        y = acc_ref[...] + b_ref[...].astype(jnp.float32)
        if activation == "gelu":
            # TODO(synk): HF BERT uses exact erf-GELU; tanh approximation kept for robust lowering.
            c = jnp.float32(0.7978845608028654)  # sqrt(2/pi)
            y = 0.5 * y * (1.0 + jnp.tanh(c * (y + 0.044715 * y * y * y)))
        o_ref[...] = y.astype(o_ref.dtype)


def dense(x, w, b, activation=None, out_dtype=jnp.bfloat16):
    M, K = x.shape
    N = w.shape[1]
    tm = _pick_tile(M, _TM, 8)
    tn = _pick_tile(N, _TN, 128)
    tk = _pick_tile(K, _TK, 128)
    return pl.pallas_call(
        functools.partial(_dense_kernel, activation=activation),
        out_shape=jax.ShapeDtypeStruct((M, N), out_dtype),
        grid=(M // tm, N // tn, K // tk),
        in_specs=[
            pl.BlockSpec((tm, tk), lambda i, j, k: (i, k)),
            pl.BlockSpec((tk, tn), lambda i, j, k: (k, j)),
            pl.BlockSpec((1, tn), lambda i, j, k: (0, j)),
        ],
        out_specs=pl.BlockSpec((tm, tn), lambda i, j, k: (i, j)),
        scratch_shapes=[pltpu.VMEM((tm, tn), jnp.float32)],
        compiler_params=pltpu.CompilerParams(
            dimension_semantics=("parallel", "parallel", "arbitrary")),
    )(x, w, b.reshape(1, N))


# --------------------- dense fused with bias + residual + LayerNorm ---------------------

def _dense_add_ln_kernel(x_ref, w_ref, b_ref, r_ref, g_ref, bt_ref, o_ref, acc_ref, *, eps):
    @pl.when(pl.program_id(1) == 0)
    def _():
        acc_ref[...] = jnp.zeros_like(acc_ref)

    acc_ref[...] += jnp.dot(x_ref[...], w_ref[...],
                            preferred_element_type=jnp.float32)

    @pl.when(pl.program_id(1) == pl.num_programs(1) - 1)
    def _():
        y = (acc_ref[...] + b_ref[...].astype(jnp.float32)
             + r_ref[...].astype(jnp.float32))
        mean = jnp.mean(y, axis=-1, keepdims=True)
        yc = y - mean
        var = jnp.mean(yc * yc, axis=-1, keepdims=True)
        y = yc * jax.lax.rsqrt(var + eps)
        y = y * g_ref[...].astype(jnp.float32) + bt_ref[...].astype(jnp.float32)
        o_ref[...] = y.astype(o_ref.dtype)


def dense_add_layernorm(x, w, b, residual, gamma, beta, eps=1e-12, out_dtype=jnp.bfloat16):
    M, K = x.shape
    N = w.shape[1]          # full hidden width: LayerNorm needs the whole row, so N is not tiled
    tm = _pick_tile(M, _TM, 8)
    tk = _pick_tile(K, _TK, 128)
    return pl.pallas_call(
        functools.partial(_dense_add_ln_kernel, eps=eps),
        out_shape=jax.ShapeDtypeStruct((M, N), out_dtype),
        grid=(M // tm, K // tk),
        in_specs=[
            pl.BlockSpec((tm, tk), lambda i, k: (i, k)),
            pl.BlockSpec((tk, N), lambda i, k: (k, 0)),
            pl.BlockSpec((1, N), lambda i, k: (0, 0)),
            pl.BlockSpec((tm, N), lambda i, k: (i, 0)),   # residual block idx constant over k
            pl.BlockSpec((1, N), lambda i, k: (0, 0)),
            pl.BlockSpec((1, N), lambda i, k: (0, 0)),
        ],
        out_specs=pl.BlockSpec((tm, N), lambda i, k: (i, 0)),
        scratch_shapes=[pltpu.VMEM((tm, N), jnp.float32)],
        compiler_params=pltpu.CompilerParams(
            dimension_semantics=("parallel", "arbitrary")),
    )(x, w, b.reshape(1, N), residual, gamma.reshape(1, N), beta.reshape(1, N))


# --------------------- embedding add + LayerNorm (row-tiled) ---------------------

def _add_ln_kernel(x_ref, r_ref, g_ref, b_ref, o_ref, *, eps):
    x = x_ref[...].astype(jnp.float32) + r_ref[...].astype(jnp.float32)
    mean = jnp.mean(x, axis=-1, keepdims=True)
    xc = x - mean
    var = jnp.mean(xc * xc, axis=-1, keepdims=True)
    y = xc * jax.lax.rsqrt(var + eps)
    y = y * g_ref[...].astype(jnp.float32) + b_ref[...].astype(jnp.float32)
    o_ref[...] = y.astype(o_ref.dtype)


def add_layernorm(x, r, g, b, eps=1e-12, out_dtype=jnp.bfloat16):
    M, H = x.shape
    tm = _pick_tile(M, 512, 8)
    return pl.pallas_call(
        functools.partial(_add_ln_kernel, eps=eps),
        out_shape=jax.ShapeDtypeStruct((M, H), out_dtype),
        grid=(M // tm,),
        in_specs=[
            pl.BlockSpec((tm, H), lambda i: (i, 0)),
            pl.BlockSpec((tm, H), lambda i: (i, 0)),
            pl.BlockSpec((1, H), lambda i: (0, 0)),
            pl.BlockSpec((1, H), lambda i: (0, 0)),
        ],
        out_specs=pl.BlockSpec((tm, H), lambda i: (i, 0)),
        compiler_params=pltpu.CompilerParams(dimension_semantics=("parallel",)),
    )(x, r, g.reshape(1, H), b.reshape(1, H))


# --------------------- multi-head attention (per-batch, lane-dense output) ---------------------

def _attention_kernel(qkv_ref, m_ref, o_ref, *, num_heads, hidden):
    Dh = hidden // num_heads
    qkv = qkv_ref[0]                                   # (S, 3H) bf16, q already pre-scaled
    m = m_ref[0].astype(jnp.float32)                   # (1, S) key mask in {0,1}
    bias = (1.0 - m) * jnp.float32(-1e9)               # (1, S) additive bias, built in-kernel
    ctx = []
    for h in range(num_heads):
        q = jax.lax.slice_in_dim(qkv, h * Dh, (h + 1) * Dh, axis=1)
        k = jax.lax.slice_in_dim(qkv, hidden + h * Dh, hidden + (h + 1) * Dh, axis=1)
        v = jax.lax.slice_in_dim(qkv, 2 * hidden + h * Dh, 2 * hidden + (h + 1) * Dh, axis=1)
        # Contract last dims directly (no explicit k.T / XLU transpose).
        s = jax.lax.dot_general(q, k, (((1,), (1,)), ((), ())),
                                preferred_element_type=jnp.float32)   # (S, S) f32
        s = s + bias                                   # broadcast over query rows
        s = s - jnp.max(s, axis=-1, keepdims=True)
        p = jnp.exp(s)
        inv_l = pl.reciprocal(jnp.sum(p, axis=-1, keepdims=True), approx=True)
        o_h = jnp.dot(p.astype(v.dtype), v, preferred_element_type=jnp.float32) * inv_l
        ctx.append(o_h)
    # Single lane-dense (S, H) store (heads folded into the last dim).
    o_ref[0] = jnp.concatenate(ctx, axis=-1).astype(o_ref.dtype)


def mha_attention(qkv, mask, num_heads):
    # TODO(synk): for long sequences (S >= ~2k) switch to flash-style KV-block tiling with
    #             online softmax; the full per-head (S,S) score matrix is fine at moderate S.
    B, S, H3 = qkv.shape
    H = H3 // 3
    return pl.pallas_call(
        functools.partial(_attention_kernel, num_heads=num_heads, hidden=H),
        out_shape=jax.ShapeDtypeStruct((B, S, H), jnp.bfloat16),
        grid=(B,),
        in_specs=[
            pl.BlockSpec((1, S, H3), lambda b: (b, 0, 0)),
            pl.BlockSpec((1, 1, S), lambda b: (b, 0, 0)),
        ],
        out_specs=pl.BlockSpec((1, S, H), lambda b: (b, 0, 0)),
        compiler_params=pltpu.CompilerParams(dimension_semantics=("parallel",)),
    )(qkv, mask)


# --------------------- parameters (deterministic synthetic init) ---------------------

def init_params(key, *, vocab, hidden, layers, intermediate, max_pos, num_labels):
    keys = jax.random.split(key, 4 + layers)

    def nrm(k, shape):
        return 0.02 * jax.random.normal(k, shape, jnp.float32)

    params = {
        "word_emb": nrm(keys[0], (vocab, hidden)),
        "pos_emb": nrm(keys[1], (max_pos, hidden)),
        "type_emb": nrm(keys[2], (2, hidden)),
        "emb_ln_g": jnp.ones((hidden,), jnp.float32),
        "emb_ln_b": jnp.zeros((hidden,), jnp.float32),
        "cls_w": nrm(keys[3], (hidden, num_labels)),
        "cls_b": jnp.zeros((num_labels,), jnp.float32),
        "layers": [],
    }
    for i in range(layers):
        lk = jax.random.split(keys[4 + i], 6)
        params["layers"].append({
            "wq": nrm(lk[0], (hidden, hidden)), "bq": jnp.zeros((hidden,), jnp.float32),
            "wk": nrm(lk[1], (hidden, hidden)), "bk": jnp.zeros((hidden,), jnp.float32),
            "wv": nrm(lk[2], (hidden, hidden)), "bv": jnp.zeros((hidden,), jnp.float32),
            "wo": nrm(lk[3], (hidden, hidden)), "bo": jnp.zeros((hidden,), jnp.float32),
            "ln1_g": jnp.ones((hidden,), jnp.float32), "ln1_b": jnp.zeros((hidden,), jnp.float32),
            "w1": nrm(lk[4], (hidden, intermediate)), "b1": jnp.zeros((intermediate,), jnp.float32),
            "w2": nrm(lk[5], (intermediate, hidden)), "b2": jnp.zeros((hidden,), jnp.float32),
            "ln2_g": jnp.ones((hidden,), jnp.float32), "ln2_b": jnp.zeros((hidden,), jnp.float32),
        })
    return params


def prepare_params(params, *, num_heads):
    """One-time weight prep: bf16 casts + fused (scaled-Q|K|V) weight/bias concat.

    Doing this once keeps the per-forward graph free of weight reshuffling.
    """
    hidden = params["word_emb"].shape[1]
    scale = 1.0 / float(hidden // num_heads) ** 0.5
    bf16 = jnp.bfloat16
    prepped = {
        "word_emb": params["word_emb"],
        "pos_emb": params["pos_emb"],
        "type_emb": params["type_emb"],
        "emb_ln_g": params["emb_ln_g"],
        "emb_ln_b": params["emb_ln_b"],
        "cls_w": params["cls_w"].astype(bf16),
        "cls_b": params["cls_b"],
        "layers": [],
    }
    for lp in params["layers"]:
        prepped["layers"].append({
            # 1/sqrt(Dh) folded into Q weight/bias: the scaling costs nothing at matmul time.
            "wqkv": jnp.concatenate(
                [lp["wq"] * scale, lp["wk"], lp["wv"]], axis=1).astype(bf16),
            "bqkv": jnp.concatenate([lp["bq"] * scale, lp["bk"], lp["bv"]]),
            "wo": lp["wo"].astype(bf16), "bo": lp["bo"],
            "ln1_g": lp["ln1_g"], "ln1_b": lp["ln1_b"],
            "w1": lp["w1"].astype(bf16), "b1": lp["b1"],
            "w2": lp["w2"].astype(bf16), "b2": lp["b2"],
            "ln2_g": lp["ln2_g"], "ln2_b": lp["ln2_b"],
        })
    return prepped


# --------------------- forward pass ---------------------

def bengali_bert_forward(params, input_ids, attention_mask, *, num_heads):
    B, S = input_ids.shape
    H = params["word_emb"].shape[1]

    # Embeddings: gather in JAX (glue); add + LayerNorm in a row-tiled kernel.
    we = jnp.take(params["word_emb"], input_ids, axis=0)            # (B, S, H)
    pe = params["pos_emb"][:S][None, :, :]
    te = params["type_emb"][0][None, None, :]                       # token_type_ids == 0
    pt = jnp.broadcast_to(pe + te, (B, S, H))
    h = add_layernorm(we.reshape(B * S, H), pt.reshape(B * S, H),
                      params["emb_ln_g"], params["emb_ln_b"])       # (B*S, H) bf16

    # (B, 1, S) key mask in {0,1}; the -1e9 additive bias is built inside the attention kernel.
    mask = attention_mask.astype(jnp.float32).reshape(B, 1, S)

    for lp in params["layers"]:
        # Fused QKV projection (pre-fused weights from prepare_params).
        qkv = dense(h, lp["wqkv"], lp["bqkv"])                           # (B*S, 3H) bf16
        ctx = mha_attention(qkv.reshape(B, S, 3 * H), mask, num_heads)   # (B, S, H) bf16
        # Attention-output projection fused with +bias, +residual, LayerNorm1.
        h = dense_add_layernorm(ctx.reshape(B * S, H), lp["wo"], lp["bo"],
                                h, lp["ln1_g"], lp["ln1_b"])
        # FFN: GELU fused into the first matmul; second matmul fused with +residual, LayerNorm2.
        ffn = dense(h, lp["w1"], lp["b1"], activation="gelu")
        h = dense_add_layernorm(ffn, lp["w2"], lp["b2"],
                                h, lp["ln2_g"], lp["ln2_b"])

    h = h.reshape(B, S, H)
    cls = h[:, 0, :]                                  # outputs.last_hidden_state[:, 0, :] -> (B, H)
    # nn.Dropout(0.3) is identity at inference (eval mode); applied as a no-op.
    logits = dense(cls, params["cls_w"], params["cls_b"],
                   out_dtype=jnp.float32)             # tiny; falls back to a single full block
    return logits


if __name__ == "__main__":
    B, S = 2, 8
    VOCAB, HIDDEN, HEADS, LAYERS, INTER, MAX_POS, NUM_LABELS = 128, 32, 4, 2, 64, 16, 3

    key = jax.random.PRNGKey(0)
    pkey, ikey = jax.random.split(key)

    params = init_params(pkey, vocab=VOCAB, hidden=HIDDEN, layers=LAYERS,
                         intermediate=INTER, max_pos=MAX_POS, num_labels=NUM_LABELS)
    prepped = prepare_params(params, num_heads=HEADS)

    input_ids = jax.random.randint(ikey, (B, S), 0, VOCAB, dtype=jnp.int32)
    attention_mask = jnp.array([[1, 1, 1, 1, 1, 1, 1, 1],
                                [1, 1, 1, 1, 1, 1, 0, 0]], dtype=jnp.int32)

    fwd = jax.jit(functools.partial(bengali_bert_forward, num_heads=HEADS))
    logits = fwd(prepped, input_ids, attention_mask)
    jax.block_until_ready(logits)
    assert logits.shape == (B, NUM_LABELS)
    print("KERNEL_OK")
</pallas_src>

<mosaic_0001>
module attributes {stable_mosaic.version = 11 : i64} {
  func.func @_dense_kernel(%arg0: i32, %arg1: i32, %arg2: i32, %arg3: memref<16x32xbf16, #tpu.memory_space<vmem>>, %arg4: memref<32x96xbf16, #tpu.memory_space<vmem>>, %arg5: memref<1x96xf32, #tpu.memory_space<vmem>>, %arg6: memref<16x96xbf16, #tpu.memory_space<vmem>>, %arg7: memref<16x96xf32, #tpu.memory_space<vmem>>) attributes {dimension_semantics = [#tpu.dimension_semantics<parallel>, #tpu.dimension_semantics<parallel>, #tpu.dimension_semantics<arbitrary>], iteration_bounds = array<i64: 1, 1, 1>, scalar_prefetch = 0 : i64, scratch_operands = 1 : i64, tpu.core_type = #tpu.core_type<tc>, window_params = [{transform_indices = @transform_0, window_bounds = array<i64: 16, 32>}, {transform_indices = @transform_1, window_bounds = array<i64: 32, 96>}, {transform_indices = @transform_2, window_bounds = array<i64: 1, 96>}, {transform_indices = @transform_3, window_bounds = array<i64: 16, 96>}]} {
    %c0_i32 = arith.constant 0 : i32
    %0 = arith.cmpi eq, %arg2, %c0_i32 : i32
    %1 = arith.extui %0 : i1 to i32
    %c0_i32_0 = arith.constant 0 : i32
    %2 = arith.cmpi ne, %1, %c0_i32_0 : i32
    scf.if %2 {
      %cst_10 = arith.constant 0.000000e+00 : f32
      %12 = vector.broadcast %cst_10 : f32 to vector<16x96xf32>
      %c0_11 = arith.constant 0 : index
      %c0_12 = arith.constant 0 : index
      %13 = vector.load %arg7[%c0_11, %c0_12] : memref<16x96xf32, #tpu.memory_space<vmem>>, vector<16x96xf32>
      tpu.vector_store %arg7[%c0_11, %c0_12], %12 {strides = array<i32>} : memref<16x96xf32, #tpu.memory_space<vmem>>, vector<16x96xf32>,
    } else {
    }
    %c0 = arith.constant 0 : index
    %c0_1 = arith.constant 0 : index
    %3 = vector.load %arg7[%c0, %c0_1] : memref<16x96xf32, #tpu.memory_space<vmem>>, vector<16x96xf32>
    %c0_2 = arith.constant 0 : index
    %c0_3 = arith.constant 0 : index
    %4 = vector.load %arg3[%c0_2, %c0_3] : memref<16x32xbf16, #tpu.memory_space<vmem>>, vector<16x32xbf16>
    %c0_4 = arith.constant 0 : index
    %c0_5 = arith.constant 0 : index
    %5 = vector.load %arg4[%c0_4, %c0_5] : memref<32x96xbf16, #tpu.memory_space<vmem>>, vector<32x96xbf16>
    %cst = arith.constant dense<0.000000e+00> : vector<16x96xf32>
    %6 = tpu.matmul %4, %5, %cst {dimension_numbers = #tpu.dot_dimension_numbers<[1], [0], [0], [1], [0, 0, 1, 1], [], []>} : vector<16x32xbf16>, vector<32x96xbf16>, vector<16x96xf32> -> vector<16x96xf32>
    %7 = arith.addf %3, %6 : vector<16x96xf32>
    %c0_6 = arith.constant 0 : index
    %c0_7 = arith.constant 0 : index
    %8 = vector.load %arg7[%c0_6, %c0_7] : memref<16x96xf32, #tpu.memory_space<vmem>>, vector<16x96xf32>
    tpu.vector_store %arg7[%c0_6, %c0_7], %7 {strides = array<i32>} : memref<16x96xf32, #tpu.memory_space<vmem>>, vector<16x96xf32>,
    %c0_i32_8 = arith.constant 0 : i32
    %9 = arith.cmpi eq, %arg2, %c0_i32_8 : i32
    %10 = arith.extui %9 : i1 to i32
    %c0_i32_9 = arith.constant 0 : i32
    %11 = arith.cmpi ne, %10, %c0_i32_9 : i32
    scf.if %11 {
      %c0_10 = arith.constant 0 : index
      %c0_11 = arith.constant 0 : index
      %12 = vector.load %arg7[%c0_10, %c0_11] : memref<16x96xf32, #tpu.memory_space<vmem>>, vector<16x96xf32>
      %c0_12 = arith.constant 0 : index
      %c0_13 = arith.constant 0 : index
      %13 = vector.load %arg5[%c0_12, %c0_13] : memref<1x96xf32, #tpu.memory_space<vmem>>, vector<1x96xf32>
      %14 = vector.broadcast %13 : vector<1x96xf32> to vector<16x96xf32>
      %15 = arith.addf %12, %14 : vector<16x96xf32>
      %16 = arith.truncf %15 : vector<16x96xf32> to vector<16x96xbf16>
      %c0_14 = arith.constant 0 : index
      %c0_15 = arith.constant 0 : index
      %17 = vector.load %arg6[%c0_14, %c0_15] : memref<16x96xbf16, #tpu.memory_space<vmem>>, vector<16x96xbf16>
      tpu.vector_store %arg6[%c0_14, %c0_15], %16 {strides = array<i32>} : memref<16x96xbf16, #tpu.memory_space<vmem>>, vector<16x96xbf16>,
    } else {
    }
    return
  }
  func.func @transform_0(%arg0: i32, %arg1: i32, %arg2: i32) -> (i32, i32) {
    %c0_i32 = arith.constant 0 : i32
    return %arg0, %arg2 : i32, i32
  }
  func.func @transform_1(%arg0: i32, %arg1: i32, %arg2: i32) -> (i32, i32) {
    %c0_i32 = arith.constant 0 : i32
    return %arg2, %arg1 : i32, i32
  }
  func.func @transform_2(%arg0: i32, %arg1: i32, %arg2: i32) -> (i32, i32) {
    %c0_i32 = arith.constant 0 : i32
    %c0_i32_0 = arith.constant 0 : i32
    return %c0_i32, %arg1 : i32, i32
  }
  func.func @transform_3(%arg0: i32, %arg1: i32, %arg2: i32) -> (i32, i32) {
    %c0_i32 = arith.constant 0 : i32
    return %arg0, %arg1 : i32, i32
  }
}

module attributes {stable_mosaic.version = 11 : i64} {
  func.func @_add_ln_kernel(%arg0: i32, %arg1: memref<16x32xf32, #tpu.memory_space<vmem>>, %arg2: memref<16x32xf32, #tpu.memory_space<vmem>>, %arg3: memref<1x32xf32, #tpu.memory_space<vmem>>, %arg4: memref<1x32xf32, #tpu.memory_space<vmem>>, %arg5: memref<16x32xbf16, #tpu.memory_space<vmem>>) attributes {dimension_semantics = [#tpu.dimension_semantics<parallel>], iteration_bounds = array<i64: 1>, scalar_prefetch = 0 : i64, scratch_operands = 0 : i64, tpu.core_type = #tpu.core_type<tc>, window_params = [{transform_indices = @transform_0, window_bounds = array<i64: 16, 32>}, {transform_indices = @transform_1, window_bounds = array<i64: 16, 32>}, {pipeline_mode = #tpu.pipeline_mode<synchronous>, transform_indices = @transform_2, window_bounds = array<i64: 1, 32>}, {pipeline_mode = #tpu.pipeline_mode<synchronous>, transform_indices = @transform_3, window_bounds = array<i64: 1, 32>}, {transform_indices = @transform_4, window_bounds = array<i64: 16, 32>}]} {
    %c0 = arith.constant 0 : index
    %c0_0 = arith.constant 0 : index
    %0 = vector.load %arg1[%c0, %c0_0] : memref<16x32xf32, #tpu.memory_space<vmem>>, vector<16x32xf32>
    %c0_1 = arith.constant 0 : index
    %c0_2 = arith.constant 0 : index
    %1 = vector.load %arg2[%c0_1, %c0_2] : memref<16x32xf32, #tpu.memory_space<vmem>>, vector<16x32xf32>
    %2 = arith.addf %0, %1 : vector<16x32xf32>
    %cst = arith.constant dense<0.000000e+00> : vector<16xf32>
    %3 = vector.multi_reduction <add>, %2, %cst [1] : vector<16x32xf32> to vector<16xf32>
    %4 = vector.shape_cast %3 : vector<16xf32> to vector<16x1xf32>
    %cst_3 = arith.constant 3.200000e+01 : f32
    %5 = vector.broadcast %cst_3 : f32 to vector<16x1xf32>
    %6 = arith.divf %4, %5 : vector<16x1xf32>
    %7 = vector.broadcast %6 : vector<16x1xf32> to vector<16x32xf32>
    %8 = arith.subf %2, %7 : vector<16x32xf32>
    %9 = arith.mulf %8, %8 : vector<16x32xf32>
    %cst_4 = arith.constant dense<0.000000e+00> : vector<16xf32>
    %10 = vector.multi_reduction <add>, %9, %cst_4 [1] : vector<16x32xf32> to vector<16xf32>
    %11 = vector.shape_cast %10 : vector<16xf32> to vector<16x1xf32>
    %cst_5 = arith.constant 3.200000e+01 : f32
    %12 = vector.broadcast %cst_5 : f32 to vector<16x1xf32>
    %13 = arith.divf %11, %12 : vector<16x1xf32>
    %cst_6 = arith.constant 9.99999996E-13 : f32
    %14 = vector.broadcast %cst_6 : f32 to vector<16x1xf32>
    %15 = arith.addf %13, %14 : vector<16x1xf32>
    %16 = math.rsqrt %15 : vector<16x1xf32>
    %17 = vector.broadcast %16 : vector<16x1xf32> to vector<16x32xf32>
    %18 = arith.mulf %8, %17 : vector<16x32xf32>
    %c0_7 = arith.constant 0 : index
    %c0_8 = arith.constant 0 : index
    %19 = vector.load %arg3[%c0_7, %c0_8] : memref<1x32xf32, #tpu.memory_space<vmem>>, vector<1x32xf32>
    %20 = vector.broadcast %19 : vector<1x32xf32> to vector<16x32xf32>
    %21 = arith.mulf %18, %20 : vector<16x32xf32>
    %c0_9 = arith.constant 0 : index
    %c0_10 = arith.constant 0 : index
    %22 = vector.load %arg4[%c0_9, %c0_10] : memref<1x32xf32, #tpu.memory_space<vmem>>, vector<1x32xf32>
    %23 = vector.broadcast %22 : vector<1x32xf32> to vector<16x32xf32>
    %24 = arith.addf %21, %23 : vector<16x32xf32>
    %25 = arith.truncf %24 : vector<16x32xf32> to vector<16x32xbf16>
    %c0_11 = arith.constant 0 : index
    %c0_12 = arith.constant 0 : index
    %26 = vector.load %arg5[%c0_11, %c0_12] : memref<16x32xbf16, #tpu.memory_space<vmem>>, vector<16x32xbf16>
    tpu.vector_store %arg5[%c0_11, %c0_12], %25 {strides = array<i32>} : memref<16x32xbf16, #tpu.memory_space<vmem>>, vector<16x32xbf16>,
    return
  }
  func.func @transform_0(%arg0: i32) -> (i32, i32) {
    %c0_i32 = arith.constant 0 : i32
    %c0_i32_0 = arith.constant 0 : i32
    return %arg0, %c0_i32 : i32, i32
  }
  func.func @transform_1(%arg0: i32) -> (i32, i32) {
    %c0_i32 = arith.constant 0 : i32
    %c0_i32_0 = arith.constant 0 : i32
    return %arg0, %c0_i32 : i32, i32
  }
  func.func @transform_2(%arg0: i32) -> (i32, i32) {
    %c0_i32 = arith.constant 0 : i32
    %c0_i32_0 = arith.constant 0 : i32
    %c0_i32_1 = arith.constant 0 : i32
    return %c0_i32, %c0_i32_0 : i32, i32
  }
  func.func @transform_3(%arg0: i32) -> (i32, i32) {
    %c0_i32 = arith.constant 0 : i32
    %c0_i32_0 = arith.constant 0 : i32
    %c0_i32_1 = arith.constant 0 : i32
    return %c0_i32, %c0_i32_0 : i32, i32
  }
  func.func @transform_4(%arg0: i32) -> (i32, i32) {
    %c0_i32 = arith.constant 0 : i32
    %c0_i32_0 = arith.constant 0 : i32
    return %arg0, %c0_i32 : i32, i32
  }
}

module attributes {stable_mosaic.version = 11 : i64} {
  func.func @_attention_kernel(%arg0: i32, %arg1: memref<1x8x96xbf16, #tpu.memory_space<vmem>>, %arg2: memref<1x1x8xf32, #tpu.memory_space<vmem>>, %arg3: memref<1x8x32xbf16, #tpu.memory_space<vmem>>) attributes {dimension_semantics = [#tpu.dimension_semantics<parallel>], iteration_bounds = array<i64: 2>, scalar_prefetch = 0 : i64, scratch_operands = 0 : i64, tpu.core_type = #tpu.core_type<tc>, window_params = [{transform_indices = @transform_0, window_bounds = array<i64: 1, 8, 96>}, {transform_indices = @transform_1, window_bounds = array<i64: 1, 1, 8>}, {transform_indices = @transform_2, window_bounds = array<i64: 1, 8, 32>}]} {
    %c0 = arith.constant 0 : index
    %c0_0 = arith.constant 0 : index
    %c0_1 = arith.constant 0 : index
    %0 = vector.load %arg1[%c0, %c0_0, %c0_1] : memref<1x8x96xbf16, #tpu.memory_space<vmem>>, vector<1x8x96xbf16>
    %1 = vector.shape_cast %0 : vector<1x8x96xbf16> to vector<8x96xbf16>
    %c0_2 = arith.constant 0 : index
    %c0_3 = arith.constant 0 : index
    %c0_4 = arith.constant 0 : index
    %2 = vector.load %arg2[%c0_2, %c0_3, %c0_4] : memref<1x1x8xf32, #tpu.memory_space<vmem>>, vector<1x1x8xf32>
    %3 = vector.shape_cast %2 : vector<1x1x8xf32> to vector<1x8xf32>
    %cst = arith.constant 1.000000e+00 : f32
    %4 = vector.broadcast %cst : f32 to vector<1x8xf32>
    %5 = arith.subf %4, %3 : vector<1x8xf32>
    %cst_5 = arith.constant -1.000000e+09 : f32
    %6 = vector.broadcast %cst_5 : f32 to vector<1x8xf32>
    %7 = arith.mulf %5, %6 : vector<1x8xf32>
    %8 = vector.extract_strided_slice %1 {offsets = [0, 0], sizes = [8, 8], strides = [1, 1]} : vector<8x96xbf16> to vector<8x8xbf16>
    %9 = vector.extract_strided_slice %1 {offsets = [0, 32], sizes = [8, 8], strides = [1, 1]} : vector<8x96xbf16> to vector<8x8xbf16>
    %10 = vector.extract_strided_slice %1 {offsets = [0, 64], sizes = [8, 8], strides = [1, 1]} : vector<8x96xbf16> to vector<8x8xbf16>
    %cst_6 = arith.constant dense<0.000000e+00> : vector<8x8xf32>
    %11 = tpu.matmul %8, %9, %cst_6 {dimension_numbers = #tpu.dot_dimension_numbers<[1], [1], [0], [0], [0, 0, 1, 0], [], []>} : vector<8x8xbf16>, vector<8x8xbf16>, vector<8x8xf32> -> vector<8x8xf32>
    %12 = vector.broadcast %7 : vector<1x8xf32> to vector<8x8xf32>
    %13 = arith.addf %11, %12 : vector<8x8xf32>
    %cst_7 = arith.constant dense<0xFF800000> : vector<8xf32>
    %14 = vector.multi_reduction <maximumf>, %13, %cst_7 [1] : vector<8x8xf32> to vector<8xf32>
    %15 = vector.shape_cast %14 : vector<8xf32> to vector<8x1xf32>
    %16 = vector.broadcast %15 : vector<8x1xf32> to vector<8x8xf32>
    %17 = arith.subf %13, %16 : vector<8x8xf32>
    %18 = math.exp %17 : vector<8x8xf32>
    %cst_8 = arith.constant dense<0.000000e+00> : vector<8xf32>
    %19 = vector.multi_reduction <add>, %18, %cst_8 [1] : vector<8x8xf32> to vector<8xf32>
    %20 = vector.shape_cast %19 : vector<8xf32> to vector<8x1xf32>
    %21 = tpu.reciprocal %20 {approx = true} : vector<8x1xf32> -> vector<8x1xf32>
    %22 = arith.truncf %18 : vector<8x8xf32> to vector<8x8xbf16>
    %cst_9 = arith.constant dense<0.000000e+00> : vector<8x8xf32>
    %23 = tpu.matmul %22, %10, %cst_9 {dimension_numbers = #tpu.dot_dimension_numbers<[1], [0], [0], [1], [0, 0, 1, 1], [], []>} : vector<8x8xbf16>, vector<8x8xbf16>, vector<8x8xf32> -> vector<8x8xf32>
    %24 = vector.broadcast %21 : vector<8x1xf32> to vector<8x8xf32>
    %25 = arith.mulf %23, %24 : vector<8x8xf32>
    %26 = vector.extract_strided_slice %1 {offsets = [0, 8], sizes = [8, 8], strides = [1, 1]} : vector<8x96xbf16> to vector<8x8xbf16>
    %27 = vector.extract_strided_slice %1 {offsets = [0, 40], sizes = [8, 8], strides = [1, 1]} : vector<8x96xbf16> to vector<8x8xbf16>
    %28 = vector.extract_strided_slice %1 {offsets = [0, 72], sizes = [8, 8], strides = [1, 1]} : vector<8x96xbf16> to vector<8x8xbf16>
    %cst_10 = arith.constant dense<0.000000e+00> : vector<8x8xf32>
    %29 = tpu.matmul %26, %27, %cst_10 {dimension_numbers = #tpu.dot_dimension_numbers<[1], [1], [0], [0], [0, 0, 1, 0], [], []>} : vector<8x8xbf16>, vector<8x8xbf16>, vector<8x8xf32> -> vector<8x8xf32>
    %30 = vector.broadcast %7 : vector<1x8xf32> to vector<8x8xf32>
    %31 = arith.addf %29, %30 : vector<8x8xf32>
    %cst_11 = arith.constant dense<0xFF800000> : vector<8xf32>
    %32 = vector.multi_reduction <maximumf>, %31, %cst_11 [1] : vector<8x8xf32> to vector<8xf32>
    %33 = vector.shape_cast %32 : vector<8xf32> to vector<8x1xf32>
    %34 = vector.broadcast %33 : vector<8x1xf32> to vector<8x8xf32>
    %35 = arith.subf %31, %34 : vector<8x8xf32>
    %36 = math.exp %35 : vector<8x8xf32>
    %cst_12 = arith.constant dense<0.000000e+00> : vector<8xf32>
    %37 = vector.multi_reduction <add>, %36, %cst_12 [1] : vector<8x8xf32> to vector<8xf32>
    %38 = vector.shape_cast %37 : vector<8xf32> to vector<8x1xf32>
    %39 = tpu.reciprocal %38 {approx = true} : vector<8x1xf32> -> vector<8x1xf32>
    %40 = arith.truncf %36 : vector<8x8xf32> to vector<8x8xbf16>
    %cst_13 = arith.constant dense<0.000000e+00> : vector<8x8xf32>
    %41 = tpu.matmul %40, %28, %cst_13 {dimension_numbers = #tpu.dot_dimension_numbers<[1], [0], [0], [1], [0, 0, 1, 1], [], []>} : vector<8x8xbf16>, vector<8x8xbf16>, vector<8x8xf32> -> vector<8x8xf32>
    %42 = vector.broadcast %39 : vector<8x1xf32> to vector<8x8xf32>
    %43 = arith.mulf %41, %42 : vector<8x8xf32>
    %44 = vector.extract_strided_slice %1 {offsets = [0, 16], sizes = [8, 8], strides = [1, 1]} : vector<8x96xbf16> to vector<8x8xbf16>
    %45 = vector.extract_strided_slice %1 {offsets = [0, 48], sizes = [8, 8], strides = [1, 1]} : vector<8x96xbf16> to vector<8x8xbf16>
    %46 = vector.extract_strided_slice %1 {offsets = [0, 80], sizes = [8, 8], strides = [1, 1]} : vector<8x96xbf16> to vector<8x8xbf16>
    %cst_14 = arith.constant dense<0.000000e+00> : vector<8x8xf32>
    %47 = tpu.matmul %44, %45, %cst_14 {dimension_numbers = #tpu.dot_dimension_numbers<[1], [1], [0], [0], [0, 0, 1, 0], [], []>} : vector<8x8xbf16>, vector<8x8xbf16>, vector<8x8xf32> -> vector<8x8xf32>
    %48 = vector.broadcast %7 : vector<1x8xf32> to vector<8x8xf32>
    %49 = arith.addf %47, %48 : vector<8x8xf32>
    %cst_15 = arith.constant dense<0xFF800000> : vector<8xf32>
    %50 = vector.multi_reduction <maximumf>, %49, %cst_15 [1] : vector<8x8xf32> to vector<8xf32>
    %51 = vector.shape_cast %50 : vector<8xf32> to vector<8x1xf32>
    %52 = vector.broadcast %51 : vector<8x1xf32> to vector<8x8xf32>
    %53 = arith.subf %49, %52 : vector<8x8xf32>
    %54 = math.exp %53 : vector<8x8xf32>
    %cst_16 = arith.constant dense<0.000000e+00> : vector<8xf32>
    %55 = vector.multi_reduction <add>, %54, %cst_16 [1] : vector<8x8xf32> to vector<8xf32>
    %56 = vector.shape_cast %55 : vector<8xf32> to vector<8x1xf32>
    %57 = tpu.reciprocal %56 {approx = true} : vector<8x1xf32> -> vector<8x1xf32>
    %58 = arith.truncf %54 : vector<8x8xf32> to vector<8x8xbf16>
    %cst_17 = arith.constant dense<0.000000e+00> : vector<8x8xf32>
    %59 = tpu.matmul %58, %46, %cst_17 {dimension_numbers = #tpu.dot_dimension_numbers<[1], [0], [0], [1], [0, 0, 1, 1], [], []>} : vector<8x8xbf16>, vector<8x8xbf16>, vector<8x8xf32> -> vector<8x8xf32>
    %60 = vector.broadcast %57 : vector<8x1xf32> to vector<8x8xf32>
    %61 = arith.mulf %59, %60 : vector<8x8xf32>
    %62 = vector.extract_strided_slice %1 {offsets = [0, 24], sizes = [8, 8], strides = [1, 1]} : vector<8x96xbf16> to vector<8x8xbf16>
    %63 = vector.extract_strided_slice %1 {offsets = [0, 56], sizes = [8, 8], strides = [1, 1]} : vector<8x96xbf16> to vector<8x8xbf16>
    %64 = vector.extract_strided_slice %1 {offsets = [0, 88], sizes = [8, 8], strides = [1, 1]} : vector<8x96xbf16> to vector<8x8xbf16>
    %cst_18 = arith.constant dense<0.000000e+00> : vector<8x8xf32>
    %65 = tpu.matmul %62, %63, %cst_18 {dimension_numbers = #tpu.dot_dimension_numbers<[1], [1], [0], [0], [0, 0, 1, 0], [], []>} : vector<8x8xbf16>, vector<8x8xbf16>, vector<8x8xf32> -> vector<8x8xf32>
    %66 = vector.broadcast %7 : vector<1x8xf32> to vector<8x8xf32>
    %67 = arith.addf %65, %66 : vector<8x8xf32>
    %cst_19 = arith.constant dense<0xFF800000> : vector<8xf32>
    %68 = vector.multi_reduction <maximumf>, %67, %cst_19 [1] : vector<8x8xf32> to vector<8xf32>
    %69 = vector.shape_cast %68 : vector<8xf32> to vector<8x1xf32>
    %70 = vector.broadcast %69 : vector<8x1xf32> to vector<8x8xf32>
    %71 = arith.subf %67, %70 : vector<8x8xf32>
    %72 = math.exp %71 : vector<8x8xf32>
    %cst_20 = arith.constant dense<0.000000e+00> : vector<8xf32>
    %73 = vector.multi_reduction <add>, %72, %cst_20 [1] : vector<8x8xf32> to vector<8xf32>
    %74 = vector.shape_cast %73 : vector<8xf32> to vector<8x1xf32>
    %75 = tpu.reciprocal %74 {approx = true} : vector<8x1xf32> -> vector<8x1xf32>
    %76 = arith.truncf %72 : vector<8x8xf32> to vector<8x8xbf16>
    %cst_21 = arith.constant dense<0.000000e+00> : vector<8x8xf32>
    %77 = tpu.matmul %76, %64, %cst_21 {dimension_numbers = #tpu.dot_dimension_numbers<[1], [0], [0], [1], [0, 0, 1, 1], [], []>} : vector<8x8xbf16>, vector<8x8xbf16>, vector<8x8xf32> -> vector<8x8xf32>
    %78 = vector.broadcast %75 : vector<8x1xf32> to vector<8x8xf32>
    %79 = arith.mulf %77, %78 : vector<8x8xf32>
    %80 = tpu.concatenate %25, %43, %61, %79 in 1 : vector<8x8xf32>, vector<8x8xf32>, vector<8x8xf32>, vector<8x8xf32> -> vector<8x32xf32>
    %81 = arith.truncf %80 : vector<8x32xf32> to vector<8x32xbf16>
    %c0_22 = arith.constant 0 : index
    %c0_23 = arith.constant 0 : index
    %c0_24 = arith.constant 0 : index
    %82 = vector.load %arg3[%c0_22, %c0_23, %c0_24] : memref<1x8x32xbf16, #tpu.memory_space<vmem>>, vector<1x8x32xbf16>
    %83 = vector.shape_cast %82 : vector<1x8x32xbf16> to vector<8x32xbf16>
    %84 = vector.shape_cast %81 : vector<8x32xbf16> to vector<1x8x32xbf16>
    tpu.vector_store %arg3[%c0_22, %c0_23, %c0_24], %84 {strides = array<i32>} : memref<1x8x32xbf16, #tpu.memory_space<vmem>>, vector<1x8x32xbf16>,
    return
  }
  func.func @transform_0(%arg0: i32) -> (i32, i32, i32) {
    %c0_i32 = arith.constant 0 : i32
    %c0_i32_0 = arith.constant 0 : i32
    %c0_i32_1 = arith.constant 0 : i32
    return %arg0, %c0_i32, %c0_i32_0 : i32, i32, i32
  }
  func.func @transform_1(%arg0: i32) -> (i32, i32, i32) {
    %c0_i32 = arith.constant 0 : i32
    %c0_i32_0 = arith.constant 0 : i32
    %c0_i32_1 = arith.constant 0 : i32
    return %arg0, %c0_i32, %c0_i32_0 : i32, i32, i32
  }
  func.func @transform_2(%arg0: i32) -> (i32, i32, i32) {
    %c0_i32 = arith.constant 0 : i32
    %c0_i32_0 = arith.constant 0 : i32
    %c0_i32_1 = arith.constant 0 : i32
    return %arg0, %c0_i32, %c0_i32_0 : i32, i32, i32
  }
}

module attributes {stable_mosaic.version = 11 : i64} {
  func.func @_dense_add_ln_kernel(%arg0: i32, %arg1: i32, %arg2: memref<16x32xbf16, #tpu.memory_space<vmem>>, %arg3: memref<32x32xbf16, #tpu.memory_space<vmem>>, %arg4: memref<1x32xf32, #tpu.memory_space<vmem>>, %arg5: memref<16x32xbf16, #tpu.memory_space<vmem>>, %arg6: memref<1x32xf32, #tpu.memory_space<vmem>>, %arg7: memref<1x32xf32, #tpu.memory_space<vmem>>, %arg8: memref<16x32xbf16, #tpu.memory_space<vmem>>, %arg9: memref<16x32xf32, #tpu.memory_space<vmem>>) attributes {dimension_semantics = [#tpu.dimension_semantics<parallel>, #tpu.dimension_semantics<arbitrary>], iteration_bounds = array<i64: 1, 1>, scalar_prefetch = 0 : i64, scratch_operands = 1 : i64, tpu.core_type = #tpu.core_type<tc>, window_params = [{transform_indices = @transform_0, window_bounds = array<i64: 16, 32>}, {transform_indices = @transform_1, window_bounds = array<i64: 32, 32>}, {pipeline_mode = #tpu.pipeline_mode<synchronous>, transform_indices = @transform_2, window_bounds = array<i64: 1, 32>}, {transform_indices = @transform_3, window_bounds = array<i64: 16, 32>}, {pipeline_mode = #tpu.pipeline_mode<synchronous>, transform_indices = @transform_4, window_bounds = array<i64: 1, 32>}, {pipeline_mode = #tpu.pipeline_mode<synchronous>, transform_indices = @transform_5, window_bounds = array<i64: 1, 32>}, {transform_indices = @transform_6, window_bounds = array<i64: 16, 32>}]} {
    %c0_i32 = arith.constant 0 : i32
    %0 = arith.cmpi eq, %arg1, %c0_i32 : i32
    %1 = arith.extui %0 : i1 to i32
    %c0_i32_0 = arith.constant 0 : i32
    %2 = arith.cmpi ne, %1, %c0_i32_0 : i32
    scf.if %2 {
      %cst_10 = arith.constant 0.000000e+00 : f32
      %12 = vector.broadcast %cst_10 : f32 to vector<16x32xf32>
      %c0_11 = arith.constant 0 : index
      %c0_12 = arith.constant 0 : index
      %13 = vector.load %arg9[%c0_11, %c0_12] : memref<16x32xf32, #tpu.memory_space<vmem>>, vector<16x32xf32>
      tpu.vector_store %arg9[%c0_11, %c0_12], %12 {strides = array<i32>} : memref<16x32xf32, #tpu.memory_space<vmem>>, vector<16x32xf32>,
    } else {
    }
    %c0 = arith.constant 0 : index
    %c0_1 = arith.constant 0 : index
    %3 = vector.load %arg9[%c0, %c0_1] : memref<16x32xf32, #tpu.memory_space<vmem>>, vector<16x32xf32>
    %c0_2 = arith.constant 0 : index
    %c0_3 = arith.constant 0 : index
    %4 = vector.load %arg2[%c0_2, %c0_3] : memref<16x32xbf16, #tpu.memory_space<vmem>>, vector<16x32xbf16>
    %c0_4 = arith.constant 0 : index
    %c0_5 = arith.constant 0 : index
    %5 = vector.load %arg3[%c0_4, %c0_5] : memref<32x32xbf16, #tpu.memory_space<vmem>>, vector<32x32xbf16>
    %cst = arith.constant dense<0.000000e+00> : vector<16x32xf32>
    %6 = tpu.matmul %4, %5, %cst {dimension_numbers = #tpu.dot_dimension_numbers<[1], [0], [0], [1], [0, 0, 1, 1], [], []>} : vector<16x32xbf16>, vector<32x32xbf16>, vector<16x32xf32> -> vector<16x32xf32>
    %7 = arith.addf %3, %6 : vector<16x32xf32>
    %c0_6 = arith.constant 0 : index
    %c0_7 = arith.constant 0 : index
    %8 = vector.load %arg9[%c0_6, %c0_7] : memref<16x32xf32, #tpu.memory_space<vmem>>, vector<16x32xf32>
    tpu.vector_store %arg9[%c0_6, %c0_7], %7 {strides = array<i32>} : memref<16x32xf32, #tpu.memory_space<vmem>>, vector<16x32xf32>,
    %c0_i32_8 = arith.constant 0 : i32
    %9 = arith.cmpi eq, %arg1, %c0_i32_8 : i32
    %10 = arith.extui %9 : i1 to i32
    %c0_i32_9 = arith.constant 0 : i32
    %11 = arith.cmpi ne, %10, %c0_i32_9 : i32
    scf.if %11 {
      %c0_10 = arith.constant 0 : index
      %c0_11 = arith.constant 0 : index
      %12 = vector.load %arg9[%c0_10, %c0_11] : memref<16x32xf32, #tpu.memory_space<vmem>>, vector<16x32xf32>
      %c0_12 = arith.constant 0 : index
      %c0_13 = arith.constant 0 : index
      %13 = vector.load %arg4[%c0_12, %c0_13] : memref<1x32xf32, #tpu.memory_space<vmem>>, vector<1x32xf32>
      %14 = vector.broadcast %13 : vector<1x32xf32> to vector<16x32xf32>
      %15 = arith.addf %12, %14 : vector<16x32xf32>
      %c0_14 = arith.constant 0 : index
      %c0_15 = arith.constant 0 : index
      %16 = vector.load %arg5[%c0_14, %c0_15] : memref<16x32xbf16, #tpu.memory_space<vmem>>, vector<16x32xbf16>
      %17 = arith.extf %16 : vector<16x32xbf16> to vector<16x32xf32>
      %18 = arith.addf %15, %17 : vector<16x32xf32>
      %cst_16 = arith.constant dense<0.000000e+00> : vector<16xf32>
      %19 = vector.multi_reduction <add>, %18, %cst_16 [1] : vector<16x32xf32> to vector<16xf32>
      %20 = vector.shape_cast %19 : vector<16xf32> to vector<16x1xf32>
      %cst_17 = arith.constant 3.200000e+01 : f32
      %21 = vector.broadcast %cst_17 : f32 to vector<16x1xf32>
      %22 = arith.divf %20, %21 : vector<16x1xf32>
      %23 = vector.broadcast %22 : vector<16x1xf32> to vector<16x32xf32>
      %24 = arith.subf %18, %23 : vector<16x32xf32>
      %25 = arith.mulf %24, %24 : vector<16x32xf32>
      %cst_18 = arith.constant dense<0.000000e+00> : vector<16xf32>
      %26 = vector.multi_reduction <add>, %25, %cst_18 [1] : vector<16x32xf32> to vector<16xf32>
      %27 = vector.shape_cast %26 : vector<16xf32> to vector<16x1xf32>
      %cst_19 = arith.constant 3.200000e+01 : f32
      %28 = vector.broadcast %cst_19 : f32 to vector<16x1xf32>
      %29 = arith.divf %27, %28 : vector<16x1xf32>
      %cst_20 = arith.constant 9.99999996E-13 : f32
      %30 = vector.broadcast %cst_20 : f32 to vector<16x1xf32>
      %31 = arith.addf %29, %30 : vector<16x1xf32>
      %32 = math.rsqrt %31 : vector<16x1xf32>
      %33 = vector.broadcast %32 : vector<16x1xf32> to vector<16x32xf32>
      %34 = arith.mulf %24, %33 : vector<16x32xf32>
      %c0_21 = arith.constant 0 : index
      %c0_22 = arith.constant 0 : index
      %35 = vector.load %arg6[%c0_21, %c0_22] : memref<1x32xf32, #tpu.memory_space<vmem>>, vector<1x32xf32>
      %36 = vector.broadcast %35 : vector<1x32xf32> to vector<16x32xf32>
      %37 = arith.mulf %34, %36 : vector<16x32xf32>
      %c0_23 = arith.constant 0 : index
      %c0_24 = arith.constant 0 : index
      %38 = vector.load %arg7[%c0_23, %c0_24] : memref<1x32xf32, #tpu.memory_space<vmem>>, vector<1x32xf32>
      %39 = vector.broadcast %38 : vector<1x32xf32> to vector<16x32xf32>
      %40 = arith.addf %37, %39 : vector<16x32xf32>
      %41 = arith.truncf %40 : vector<16x32xf32> to vector<16x32xbf16>
      %c0_25 = arith.constant 0 : index
      %c0_26 = arith.constant 0 : index
      %42 = vector.load %arg8[%c0_25, %c0_26] : memref<16x32xbf16, #tpu.memory_space<vmem>>, vector<16x32xbf16>
      tpu.vector_store %arg8[%c0_25, %c0_26], %41 {strides = array<i32>} : memref<16x32xbf16, #tpu.memory_space<vmem>>, vector<16x32xbf16>,
    } else {
    }
    return
  }
  func.func @transform_0(%arg0: i32, %arg1: i32) -> (i32, i32) {
    %c0_i32 = arith.constant 0 : i32
    return %arg0, %arg1 : i32, i32
  }
  func.func @transform_1(%arg0: i32, %arg1: i32) -> (i32, i32) {
    %c0_i32 = arith.constant 0 : i32
    %c0_i32_0 = arith.constant 0 : i32
    return %arg1, %c0_i32 : i32, i32
  }
  func.func @transform_2(%arg0: i32, %arg1: i32) -> (i32, i32) {
    %c0_i32 = arith.constant 0 : i32
    %c0_i32_0 = arith.constant 0 : i32
    %c0_i32_1 = arith.constant 0 : i32
    return %c0_i32, %c0_i32_0 : i32, i32
  }
  func.func @transform_3(%arg0: i32, %arg1: i32) -> (i32, i32) {
    %c0_i32 = arith.constant 0 : i32
    %c0_i32_0 = arith.constant 0 : i32
    return %arg0, %c0_i32 : i32, i32
  }
  func.func @transform_4(%arg0: i32, %arg1: i32) -> (i32, i32) {
    %c0_i32 = arith.constant 0 : i32
    %c0_i32_0 = arith.constant 0 : i32
    %c0_i32_1 = arith.constant 0 : i32
    return %c0_i32, %c0_i32_0 : i32, i32
  }
  func.func @transform_5(%arg0: i32, %arg1: i32) -> (i32, i32) {
    %c0_i32 = arith.constant 0 : i32
    %c0_i32_0 = arith.constant 0 : i32
    %c0_i32_1 = arith.constant 0 : i32
    return %c0_i32, %c0_i32_0 : i32, i32
  }
  func.func @transform_6(%arg0: i32, %arg1: i32) -> (i32, i32) {
    %c0_i32 = arith.constant 0 : i32
    %c0_i32_0 = arith.constant 0 : i32
    return %arg0, %c0_i32 : i32, i32
  }
}

module attributes {stable_mosaic.version = 11 : i64} {
  func.func @_dense_kernel(%arg0: i32, %arg1: i32, %arg2: i32, %arg3: memref<16x32xbf16, #tpu.memory_space<vmem>>, %arg4: memref<32x64xbf16, #tpu.memory_space<vmem>>, %arg5: memref<1x64xf32, #tpu.memory_space<vmem>>, %arg6: memref<16x64xbf16, #tpu.memory_space<vmem>>, %arg7: memref<16x64xf32, #tpu.memory_space<vmem>>) attributes {dimension_semantics = [#tpu.dimension_semantics<parallel>, #tpu.dimension_semantics<parallel>, #tpu.dimension_semantics<arbitrary>], iteration_bounds = array<i64: 1, 1, 1>, scalar_prefetch = 0 : i64, scratch_operands = 1 : i64, tpu.core_type = #tpu.core_type<tc>, window_params = [{transform_indices = @transform_0, window_bounds = array<i64: 16, 32>}, {transform_indices = @transform_1, window_bounds = array<i64: 32, 64>}, {transform_indices = @transform_2, window_bounds = array<i64: 1, 64>}, {transform_indices = @transform_3, window_bounds = array<i64: 16, 64>}]} {
    %c0_i32 = arith.constant 0 : i32
    %0 = arith.cmpi eq, %arg2, %c0_i32 : i32
    %1 = arith.extui %0 : i1 to i32
    %c0_i32_0 = arith.constant 0 : i32
    %2 = arith.cmpi ne, %1, %c0_i32_0 : i32
    scf.if %2 {
      %cst_10 = arith.constant 0.000000e+00 : f32
      %12 = vector.broadcast %cst_10 : f32 to vector<16x64xf32>
      %c0_11 = arith.constant 0 : index
      %c0_12 = arith.constant 0 : index
      %13 = vector.load %arg7[%c0_11, %c0_12] : memref<16x64xf32, #tpu.memory_space<vmem>>, vector<16x64xf32>
      tpu.vector_store %arg7[%c0_11, %c0_12], %12 {strides = array<i32>} : memref<16x64xf32, #tpu.memory_space<vmem>>, vector<16x64xf32>,
    } else {
    }
    %c0 = arith.constant 0 : index
    %c0_1 = arith.constant 0 : index
    %3 = vector.load %arg7[%c0, %c0_1] : memref<16x64xf32, #tpu.memory_space<vmem>>, vector<16x64xf32>
    %c0_2 = arith.constant 0 : index
    %c0_3 = arith.constant 0 : index
    %4 = vector.load %arg3[%c0_2, %c0_3] : memref<16x32xbf16, #tpu.memory_space<vmem>>, vector<16x32xbf16>
    %c0_4 = arith.constant 0 : index
    %c0_5 = arith.constant 0 : index
    %5 = vector.load %arg4[%c0_4, %c0_5] : memref<32x64xbf16, #tpu.memory_space<vmem>>, vector<32x64xbf16>
    %cst = arith.constant dense<0.000000e+00> : vector<16x64xf32>
    %6 = tpu.matmul %4, %5, %cst {dimension_numbers = #tpu.dot_dimension_numbers<[1], [0], [0], [1], [0, 0, 1, 1], [], []>} : vector<16x32xbf16>, vector<32x64xbf16>, vector<16x64xf32> -> vector<16x64xf32>
    %7 = arith.addf %3, %6 : vector<16x64xf32>
    %c0_6 = arith.constant 0 : index
    %c0_7 = arith.constant 0 : index
    %8 = vector.load %arg7[%c0_6, %c0_7] : memref<16x64xf32, #tpu.memory_space<vmem>>, vector<16x64xf32>
    tpu.vector_store %arg7[%c0_6, %c0_7], %7 {strides = array<i32>} : memref<16x64xf32, #tpu.memory_space<vmem>>, vector<16x64xf32>,
    %c0_i32_8 = arith.constant 0 : i32
    %9 = arith.cmpi eq, %arg2, %c0_i32_8 : i32
    %10 = arith.extui %9 : i1 to i32
    %c0_i32_9 = arith.constant 0 : i32
    %11 = arith.cmpi ne, %10, %c0_i32_9 : i32
    scf.if %11 {
      %c0_10 = arith.constant 0 : index
      %c0_11 = arith.constant 0 : index
      %12 = vector.load %arg7[%c0_10, %c0_11] : memref<16x64xf32, #tpu.memory_space<vmem>>, vector<16x64xf32>
      %c0_12 = arith.constant 0 : index
      %c0_13 = arith.constant 0 : index
      %13 = vector.load %arg5[%c0_12, %c0_13] : memref<1x64xf32, #tpu.memory_space<vmem>>, vector<1x64xf32>
      %14 = vector.broadcast %13 : vector<1x64xf32> to vector<16x64xf32>
      %15 = arith.addf %12, %14 : vector<16x64xf32>
      %cst_14 = arith.constant 5.000000e-01 : f32
      %16 = vector.broadcast %cst_14 : f32 to vector<16x64xf32>
      %17 = arith.mulf %16, %15 : vector<16x64xf32>
      %cst_15 = arith.constant 4.471500e-02 : f32
      %18 = vector.broadcast %cst_15 : f32 to vector<16x64xf32>
      %19 = arith.mulf %18, %15 : vector<16x64xf32>
      %20 = arith.mulf %19, %15 : vector<16x64xf32>
      %21 = arith.mulf %20, %15 : vector<16x64xf32>
      %22 = arith.addf %15, %21 : vector<16x64xf32>
      %cst_16 = arith.constant 0.797884583 : f32
      %23 = vector.broadcast %cst_16 : f32 to vector<16x64xf32>
      %24 = arith.mulf %23, %22 : vector<16x64xf32>
      %25 = math.tanh %24 : vector<16x64xf32>
      %cst_17 = arith.constant 1.000000e+00 : f32
      %26 = vector.broadcast %cst_17 : f32 to vector<16x64xf32>
      %27 = arith.addf %26, %25 : vector<16x64xf32>
      %28 = arith.mulf %17, %27 : vector<16x64xf32>
      %29 = arith.truncf %28 : vector<16x64xf32> to vector<16x64xbf16>
      %c0_18 = arith.constant 0 : index
      %c0_19 = arith.constant 0 : index
      %30 = vector.load %arg6[%c0_18, %c0_19] : memref<16x64xbf16, #tpu.memory_space<vmem>>, vector<16x64xbf16>
      tpu.vector_store %arg6[%c0_18, %c0_19], %29 {strides = array<i32>} : memref<16x64xbf16, #tpu.memory_space<vmem>>, vector<16x64xbf16>,
    } else {
    }
    return
  }
  func.func @transform_0(%arg0: i32, %arg1: i32, %arg2: i32) -> (i32, i32) {
    %c0_i32 = arith.constant 0 : i32
    return %arg0, %arg2 : i32, i32
  }
  func.func @transform_1(%arg0: i32, %arg1: i32, %arg2: i32) -> (i32, i32) {
    %c0_i32 = arith.constant 0 : i32
    return %arg2, %arg1 : i32, i32
  }
  func.func @transform_2(%arg0: i32, %arg1: i32, %arg2: i32) -> (i32, i32) {
    %c0_i32 = arith.constant 0 : i32
    %c0_i32_0 = arith.constant 0 : i32
    return %c0_i32, %arg1 : i32, i32
  }
  func.func @transform_3(%arg0: i32, %arg1: i32, %arg2: i32) -> (i32, i32) {
    %c0_i32 = arith.constant 0 : i32
    return %arg0, %arg1 : i32, i32
  }
}

module attributes {stable_mosaic.version = 11 : i64} {
  func.func @_dense_add_ln_kernel(%arg0: i32, %arg1: i32, %arg2: memref<16x64xbf16, #tpu.memory_space<vmem>>, %arg3: memref<64x32xbf16, #tpu.memory_space<vmem>>, %arg4: memref<1x32xf32, #tpu.memory_space<vmem>>, %arg5: memref<16x32xbf16, #tpu.memory_space<vmem>>, %arg6: memref<1x32xf32, #tpu.memory_space<vmem>>, %arg7: memref<1x32xf32, #tpu.memory_space<vmem>>, %arg8: memref<16x32xbf16, #tpu.memory_space<vmem>>, %arg9: memref<16x32xf32, #tpu.memory_space<vmem>>) attributes {dimension_semantics = [#tpu.dimension_semantics<parallel>, #tpu.dimension_semantics<arbitrary>], iteration_bounds = array<i64: 1, 1>, scalar_prefetch = 0 : i64, scratch_operands = 1 : i64, tpu.core_type = #tpu.core_type<tc>, window_params = [{transform_indices = @transform_0, window_bounds = array<i64: 16, 64>}, {transform_indices = @transform_1, window_bounds = array<i64: 64, 32>}, {pipeline_mode = #tpu.pipeline_mode<synchronous>, transform_indices = @transform_2, window_bounds = array<i64: 1, 32>}, {transform_indices = @transform_3, window_bounds = array<i64: 16, 32>}, {pipeline_mode = #tpu.pipeline_mode<synchronous>, transform_indices = @transform_4, window_bounds = array<i64: 1, 32>}, {pipeline_mode = #tpu.pipeline_mode<synchronous>, transform_indices = @transform_5, window_bounds = array<i64: 1, 32>}, {transform_indices = @transform_6, window_bounds = array<i64: 16, 32>}]} {
    %c0_i32 = arith.constant 0 : i32
    %0 = arith.cmpi eq, %arg1, %c0_i32 : i32
    %1 = arith.extui %0 : i1 to i32
    %c0_i32_0 = arith.constant 0 : i32
    %2 = arith.cmpi ne, %1, %c0_i32_0 : i32
    scf.if %2 {
      %cst_10 = arith.constant 0.000000e+00 : f32
      %12 = vector.broadcast %cst_10 : f32 to vector<16x32xf32>
      %c0_11 = arith.constant 0 : index
      %c0_12 = arith.constant 0 : index
      %13 = vector.load %arg9[%c0_11, %c0_12] : memref<16x32xf32, #tpu.memory_space<vmem>>, vector<16x32xf32>
      tpu.vector_store %arg9[%c0_11, %c0_12], %12 {strides = array<i32>} : memref<16x32xf32, #tpu.memory_space<vmem>>, vector<16x32xf32>,
    } else {
    }
    %c0 = arith.constant 0 : index
    %c0_1 = arith.constant 0 : index
    %3 = vector.load %arg9[%c0, %c0_1] : memref<16x32xf32, #tpu.memory_space<vmem>>, vector<16x32xf32>
    %c0_2 = arith.constant 0 : index
    %c0_3 = arith.constant 0 : index
    %4 = vector.load %arg2[%c0_2, %c0_3] : memref<16x64xbf16, #tpu.memory_space<vmem>>, vector<16x64xbf16>
    %c0_4 = arith.constant 0 : index
    %c0_5 = arith.constant 0 : index
    %5 = vector.load %arg3[%c0_4, %c0_5] : memref<64x32xbf16, #tpu.memory_space<vmem>>, vector<64x32xbf16>
    %cst = arith.constant dense<0.000000e+00> : vector<16x32xf32>
    %6 = tpu.matmul %4, %5, %cst {dimension_numbers = #tpu.dot_dimension_numbers<[1], [0], [0], [1], [0, 0, 1, 1], [], []>} : vector<16x64xbf16>, vector<64x32xbf16>, vector<16x32xf32> -> vector<16x32xf32>
    %7 = arith.addf %3, %6 : vector<16x32xf32>
    %c0_6 = arith.constant 0 : index
    %c0_7 = arith.constant 0 : index
    %8 = vector.load %arg9[%c0_6, %c0_7] : memref<16x32xf32, #tpu.memory_space<vmem>>, vector<16x32xf32>
    tpu.vector_store %arg9[%c0_6, %c0_7], %7 {strides = array<i32>} : memref<16x32xf32, #tpu.memory_space<vmem>>, vector<16x32xf32>,
    %c0_i32_8 = arith.constant 0 : i32
    %9 = arith.cmpi eq, %arg1, %c0_i32_8 : i32
    %10 = arith.extui %9 : i1 to i32
    %c0_i32_9 = arith.constant 0 : i32
    %11 = arith.cmpi ne, %10, %c0_i32_9 : i32
    scf.if %11 {
      %c0_10 = arith.constant 0 : index
      %c0_11 = arith.constant 0 : index
      %12 = vector.load %arg9[%c0_10, %c0_11] : memref<16x32xf32, #tpu.memory_space<vmem>>, vector<16x32xf32>
      %c0_12 = arith.constant 0 : index
      %c0_13 = arith.constant 0 : index
      %13 = vector.load %arg4[%c0_12, %c0_13] : memref<1x32xf32, #tpu.memory_space<vmem>>, vector<1x32xf32>
      %14 = vector.broadcast %13 : vector<1x32xf32> to vector<16x32xf32>
      %15 = arith.addf %12, %14 : vector<16x32xf32>
      %c0_14 = arith.constant 0 : index
      %c0_15 = arith.constant 0 : index
      %16 = vector.load %arg5[%c0_14, %c0_15] : memref<16x32xbf16, #tpu.memory_space<vmem>>, vector<16x32xbf16>
      %17 = arith.extf %16 : vector<16x32xbf16> to vector<16x32xf32>
      %18 = arith.addf %15, %17 : vector<16x32xf32>
      %cst_16 = arith.constant dense<0.000000e+00> : vector<16xf32>
      %19 = vector.multi_reduction <add>, %18, %cst_16 [1] : vector<16x32xf32> to vector<16xf32>
      %20 = vector.shape_cast %19 : vector<16xf32> to vector<16x1xf32>
      %cst_17 = arith.constant 3.200000e+01 : f32
      %21 = vector.broadcast %cst_17 : f32 to vector<16x1xf32>
      %22 = arith.divf %20, %21 : vector<16x1xf32>
      %23 = vector.broadcast %22 : vector<16x1xf32> to vector<16x32xf32>
      %24 = arith.subf %18, %23 : vector<16x32xf32>
      %25 = arith.mulf %24, %24 : vector<16x32xf32>
      %cst_18 = arith.constant dense<0.000000e+00> : vector<16xf32>
      %26 = vector.multi_reduction <add>, %25, %cst_18 [1] : vector<16x32xf32> to vector<16xf32>
      %27 = vector.shape_cast %26 : vector<16xf32> to vector<16x1xf32>
      %cst_19 = arith.constant 3.200000e+01 : f32
      %28 = vector.broadcast %cst_19 : f32 to vector<16x1xf32>
      %29 = arith.divf %27, %28 : vector<16x1xf32>
      %cst_20 = arith.constant 9.99999996E-13 : f32
      %30 = vector.broadcast %cst_20 : f32 to vector<16x1xf32>
      %31 = arith.addf %29, %30 : vector<16x1xf32>
      %32 = math.rsqrt %31 : vector<16x1xf32>
      %33 = vector.broadcast %32 : vector<16x1xf32> to vector<16x32xf32>
      %34 = arith.mulf %24, %33 : vector<16x32xf32>
      %c0_21 = arith.constant 0 : index
      %c0_22 = arith.constant 0 : index
      %35 = vector.load %arg6[%c0_21, %c0_22] : memref<1x32xf32, #tpu.memory_space<vmem>>, vector<1x32xf32>
      %36 = vector.broadcast %35 : vector<1x32xf32> to vector<16x32xf32>
      %37 = arith.mulf %34, %36 : vector<16x32xf32>
      %c0_23 = arith.constant 0 : index
      %c0_24 = arith.constant 0 : index
      %38 = vector.load %arg7[%c0_23, %c0_24] : memref<1x32xf32, #tpu.memory_space<vmem>>, vector<1x32xf32>
      %39 = vector.broadcast %38 : vector<1x32xf32> to vector<16x32xf32>
      %40 = arith.addf %37, %39 : vector<16x32xf32>
      %41 = arith.truncf %40 : vector<16x32xf32> to vector<16x32xbf16>
      %c0_25 = arith.constant 0 : index
      %c0_26 = arith.constant 0 : index
      %42 = vector.load %arg8[%c0_25, %c0_26] : memref<16x32xbf16, #tpu.memory_space<vmem>>, vector<16x32xbf16>
      tpu.vector_store %arg8[%c0_25, %c0_26], %41 {strides = array<i32>} : memref<16x32xbf16, #tpu.memory_space<vmem>>, vector<16x32xbf16>,
    } else {
    }
    return
  }
  func.func @transform_0(%arg0: i32, %arg1: i32) -> (i32, i32) {
    %c0_i32 = arith.constant 0 : i32
    return %arg0, %arg1 : i32, i32
  }
  func.func @transform_1(%arg0: i32, %arg1: i32) -> (i32, i32) {
    %c0_i32 = arith.constant 0 : i32
    %c0_i32_0 = arith.constant 0 : i32
    return %arg1, %c0_i32 : i32, i32
  }
  func.func @transform_2(%arg0: i32, %arg1: i32) -> (i32, i32) {
    %c0_i32 = arith.constant 0 : i32
    %c0_i32_0 = arith.constant 0 : i32
    %c0_i32_1 = arith.constant 0 : i32
    return %c0_i32, %c0_i32_0 : i32, i32
  }
  func.func @transform_3(%arg0: i32, %arg1: i32) -> (i32, i32) {
    %c0_i32 = arith.constant 0 : i32
    %c0_i32_0 = arith.constant 0 : i32
    return %arg0, %c0_i32 : i32, i32
  }
  func.func @transform_4(%arg0: i32, %arg1: i32) -> (i32, i32) {
    %c0_i32 = arith.constant 0 : i32
    %c0_i32_0 = arith.constant 0 : i32
    %c0_i32_1 = arith.constant 0 : i32
    return %c0_i32, %c0_i32_0 : i32, i32
  }
  func.func @transform_5(%arg0: i32, %arg1: i32) -> (i32, i32) {
    %c0_i32 = arith.constant 0 : i32
    %c0_i32_0 = arith.constant 0 : i32
    %c0_i32_1 = arith.constant 0 : i32
    return %c0_i32, %c0_i32_0 : i32, i32
  }
  func.func @transform_6(%arg0: i32, %arg1: i32) -> (i32, i32) {
    %c0_i32 = arith.constant 0 : i32
    %c0_i32_0 = arith.constant 0 : i32
    return %arg0, %c0_i32 : i32, i32
  }
}

module attributes {stable_mosaic.version = 11 : i64} {
  func.func @_dense_kernel(%arg0: i32, %arg1: i32, %arg2: i32, %arg3: memref<2x32xbf16, #tpu.memory_space<vmem>>, %arg4: memref<32x3xbf16, #tpu.memory_space<vmem>>, %arg5: memref<1x3xf32, #tpu.memory_space<vmem>>, %arg6: memref<2x3xf32, #tpu.memory_space<vmem>>, %arg7: memref<2x3xf32, #tpu.memory_space<vmem>>) attributes {dimension_semantics = [#tpu.dimension_semantics<parallel>, #tpu.dimension_semantics<parallel>, #tpu.dimension_semantics<arbitrary>], iteration_bounds = array<i64: 1, 1, 1>, scalar_prefetch = 0 : i64, scratch_operands = 1 : i64, tpu.core_type = #tpu.core_type<tc>, window_params = [{transform_indices = @transform_0, window_bounds = array<i64: 2, 32>}, {transform_indices = @transform_1, window_bounds = array<i64: 32, 3>}, {transform_indices = @transform_2, window_bounds = array<i64: 1, 3>}, {transform_indices = @transform_3, window_bounds = array<i64: 2, 3>}]} {
    %c0_i32 = arith.constant 0 : i32
    %0 = arith.cmpi eq, %arg2, %c0_i32 : i32
    %1 = arith.extui %0 : i1 to i32
    %c0_i32_0 = arith.constant 0 : i32
    %2 = arith.cmpi ne, %1, %c0_i32_0 : i32
    scf.if %2 {
      %cst_10 = arith.constant 0.000000e+00 : f32
      %12 = vector.broadcast %cst_10 : f32 to vector<2x3xf32>
      %c0_11 = arith.constant 0 : index
      %c0_12 = arith.constant 0 : index
      %13 = vector.load %arg7[%c0_11, %c0_12] : memref<2x3xf32, #tpu.memory_space<vmem>>, vector<2x3xf32>
      tpu.vector_store %arg7[%c0_11, %c0_12], %12 {strides = array<i32>} : memref<2x3xf32, #tpu.memory_space<vmem>>, vector<2x3xf32>,
    } else {
    }
    %c0 = arith.constant 0 : index
    %c0_1 = arith.constant 0 : index
    %3 = vector.load %arg7[%c0, %c0_1] : memref<2x3xf32, #tpu.memory_space<vmem>>, vector<2x3xf32>
    %c0_2 = arith.constant 0 : index
    %c0_3 = arith.constant 0 : index
    %4 = vector.load %arg3[%c0_2, %c0_3] : memref<2x32xbf16, #tpu.memory_space<vmem>>, vector<2x32xbf16>
    %c0_4 = arith.constant 0 : index
    %c0_5 = arith.constant 0 : index
    %5 = vector.load %arg4[%c0_4, %c0_5] : memref<32x3xbf16, #tpu.memory_space<vmem>>, vector<32x3xbf16>
    %cst = arith.constant dense<0.000000e+00> : vector<2x3xf32>
    %6 = tpu.matmul %4, %5, %cst {dimension_numbers = #tpu.dot_dimension_numbers<[1], [0], [0], [1], [0, 0, 1, 1], [], []>} : vector<2x32xbf16>, vector<32x3xbf16>, vector<2x3xf32> -> vector<2x3xf32>
    %7 = arith.addf %3, %6 : vector<2x3xf32>
    %c0_6 = arith.constant 0 : index
    %c0_7 = arith.constant 0 : index
    %8 = vector.load %arg7[%c0_6, %c0_7] : memref<2x3xf32, #tpu.memory_space<vmem>>, vector<2x3xf32>
    tpu.vector_store %arg7[%c0_6, %c0_7], %7 {strides = array<i32>} : memref<2x3xf32, #tpu.memory_space<vmem>>, vector<2x3xf32>,
    %c0_i32_8 = arith.constant 0 : i32
    %9 = arith.cmpi eq, %arg2, %c0_i32_8 : i32
    %10 = arith.extui %9 : i1 to i32
    %c0_i32_9 = arith.constant 0 : i32
    %11 = arith.cmpi ne, %10, %c0_i32_9 : i32
    scf.if %11 {
      %c0_10 = arith.constant 0 : index
      %c0_11 = arith.constant 0 : index
      %12 = vector.load %arg7[%c0_10, %c0_11] : memref<2x3xf32, #tpu.memory_space<vmem>>, vector<2x3xf32>
      %c0_12 = arith.constant 0 : index
      %c0_13 = arith.constant 0 : index
      %13 = vector.load %arg5[%c0_12, %c0_13] : memref<1x3xf32, #tpu.memory_space<vmem>>, vector<1x3xf32>
      %14 = vector.broadcast %13 : vector<1x3xf32> to vector<2x3xf32>
      %15 = arith.addf %12, %14 : vector<2x3xf32>
      %c0_14 = arith.constant 0 : index
      %c0_15 = arith.constant 0 : index
      %16 = vector.load %arg6[%c0_14, %c0_15] : memref<2x3xf32, #tpu.memory_space<vmem>>, vector<2x3xf32>
      tpu.vector_store %arg6[%c0_14, %c0_15], %15 {strides = array<i32>} : memref<2x3xf32, #tpu.memory_space<vmem>>, vector<2x3xf32>,
    } else {
    }
    return
  }
  func.func @transform_0(%arg0: i32, %arg1: i32, %arg2: i32) -> (i32, i32) {
    %c0_i32 = arith.constant 0 : i32
    return %arg0, %arg2 : i32, i32
  }
  func.func @transform_1(%arg0: i32, %arg1: i32, %arg2: i32) -> (i32, i32) {
    %c0_i32 = arith.constant 0 : i32
    return %arg2, %arg1 : i32, i32
  }
  func.func @transform_2(%arg0: i32, %arg1: i32, %arg2: i32) -> (i32, i32) {
    %c0_i32 = arith.constant 0 : i32
    %c0_i32_0 = arith.constant 0 : i32
    return %c0_i32, %arg1 : i32, i32
  }
  func.func @transform_3(%arg0: i32, %arg1: i32, %arg2: i32) -> (i32, i32) {
    %c0_i32 = arith.constant 0 : i32
    return %arg0, %arg1 : i32, i32
  }
}

</mosaic_0001>

<bundles_post_ra>
// kernel: bengali_bert_forward.12
= control target key start
LH: loop header
LB: loop body
LE: loop exit
PB: predicated region body
PF: predicated region fallthrough
CT: control target
= control target key end

     0   :  { %vm23_vm0 = vcmask 261120   ;;  %vm77_vm1 = vcmask 257024   ;;  %s147_s0 = inlined_call_operand.vmem [shape: f32[16,32], index: 0, kind: input, shape index: {}]   ;;  %s148_s1 = inlined_call_operand.vmem [shape: f32[16,32], index: 1, kind: input, shape index: {}]   ;;  %s149_s2 = inlined_call_operand.vmem [shape: f32[1,32], index: 2, kind: input, shape index: {}]   ;;  %s150_s3 = inlined_call_operand.vmem [shape: f32[1,32], index: 3, kind: input, shape index: {}]   ;;  %s151_s4 = inlined_call_operand.vmem [shape: bf16[16,32], index: 4, kind: output, shape index: {}]  }
   0x1   :  { %v17_v0 = vld [vmem:[%s147_s0] sm:$0xff]  ;;  %v18_v2 = vld [vmem:[%s147_s0 + $0x8] sm:$0xff] }
   0x2   :  { %v19_v1 = vld [vmem:[%s148_s1] sm:$0xff]  ;;  %v20_v4 = vld [vmem:[%s148_s1 + $0x8] sm:$0xff] }
   0x3   :  { %v21_v3 = vadd.f32 %v19_v1, %v17_v0  ;;  %v22_v5 = vadd.f32 %v20_v4, %v18_v2  ;;  %v84_v25 = vld [vmem:[%s149_s2] ss:$0 sm:$0xff] }
   0x4   :  { %v85_v27 = vld [vmem:[%s150_s3] ss:$0 sm:$0xff] }
   0x5   :  { %v24_v6 = vsel %vm23_vm0, %v21_v3, 0.0  ;;  %v27_v7 = vsel %vm23_vm0, %v22_v5, 0.0 }
   0x6   :  { %25 = vadd.xlane.f32.xlu0 %v24_v6 }
   0xa   :  { %28 = vadd.xlane.f32.xlu0 %v27_v7 }
  0x93   :  { %v26_v8 = vpop.xlane.xlu0 %25 }
  0x94   :  { %v31_v9 = vmul.f32 0.03125, %v26_v8 }
  0x96   :  { %v33_v10 = vsub.f32 %v21_v3, %v31_v9 }
  0x97   :  { %v29_v11 = vpop.xlane.xlu0 %28 }
  0x98   :  { %v32_v12 = vmul.f32 0.03125, %v29_v11  ;;  %v35_v13 = vmul.f32 %v33_v10, %v33_v10 }
  0x9a   :  { %v34_v14 = vsub.f32 %v22_v5, %v32_v12  ;;  %v37_v15 = vsel %vm23_vm0, %v35_v13, 0.0 }
  0x9b   :  { %38 = vadd.xlane.f32.xlu1 %v37_v15 }
  0x9c   :  { %v36_v16 = vmul.f32 %v34_v14, %v34_v14 }
  0x9e   :  { %v40_v17 = vsel %vm23_vm0, %v36_v16, 0.0 }
  0x9f   :  { %41 = vadd.xlane.f32.xlu1 %v40_v17 }
 0x128   :  { %v39_v18 = vpop.xlane.xlu1 %38 }
 0x129   :  { %v43_v19 = vmul.f32 0.03125, %v39_v18 }
 0x12b   :  { %v45_v20 = vadd.f32 1e-12, %v43_v19 }
 0x12c   :  { %v42_v21 = vpop.xlane.xlu1 %41 }
 0x12d   :  { %90 = vrsqrt.f32 %v45_v20  ;;  %v44_v22 = vmul.f32 0.03125, %v42_v21 }
 0x12f   :  { %v46_v23 = vadd.f32 1e-12, %v44_v22 }
 0x131   :  { %92 = vrsqrt.f32 %v46_v23 }
 0x137   :  { %v91_v24 = vpop.eup %90 }
 0x138   :  { %v49_v26 = vmul.f32 %v91_v24, %v33_v10 }
 0x13a   :  { %v58_v28 = vmul.f32 %v84_v25, %v49_v26 }
 0x13b   :  { %v93_v29 = vpop.eup %92 }
 0x13c   :  { %v67_v30 = vadd.f32 %v85_v27, %v58_v28  ;;  %v50_v31 = vmul.f32 %v93_v29, %v34_v14 }
 0x13e   :  { %v88_v32 = vpack.c.bf16 %v67_v30, %v67_v30  ;;  %v59_v33 = vmul.f32 %v84_v25, %v50_v31 }
 0x140   :  { %78 = vst.msk [vmem:[%s151_s4] sm:$0xf] %vm77_vm1, %v88_v32  ;;  %v68_v34 = vadd.f32 %v85_v27, %v59_v33 }
 0x142   :  { %v89_v35 = vpack.c.bf16 %v68_v34, %v68_v34 }
 0x144   :  { %79 = vst.msk [vmem:[%s151_s4 + $0x4] sm:$0xf] %vm77_vm1, %v89_v35 }

// kernel: bengali_bert_forward.13
= control target key start
LH: loop header
LB: loop body
LE: loop exit
PB: predicated region body
PF: predicated region fallthrough
CT: control target
= control target key end

     0   :  { %vm19_vm0 = vcmask 785408   ;;  %v151_v0 = vmov 0.0   ;;  %vm152_vm1 = vmmov 0   ;;  %vm47_vm2 = vcmask 261120   ;;  %s195_s1 = inlined_call_operand.vmem [shape: bf16[32,96], index: 1, kind: input, shape index: {}]   ;;  %s196_s0 = inlined_call_operand.vmem [shape: bf16[16,32], index: 0, kind: input, shape index: {}]   ;;  %s197_s2 = inlined_call_operand.vmem [shape: f32[1,96], index: 2, kind: input, shape index: {}]   ;;  %s198_s3 = inlined_call_operand.vmem [shape: bf16[16,96], index: 3, kind: output, shape index: {}]  }
   0x1   :  { %138 = vmatprep.subr.bf16.mxu0 %v151_v0  ;;  %v148_v1 = vld [vmem:[%s195_s1] sm:$0xff]   ;;  %142 = vmatprep.mubr.msk.bf16.mxu0 %vm152_vm1, %v151_v0  ;;  %20 = vst.msk [vmem:[#allocation2] sm:$0xff] %vm19_vm0, %v151_v0  ;;  %21 = vst.msk [vmem:[#allocation2 + $0x8] sm:$0xff] %vm19_vm0, %v151_v0  ;;  %v149_v2 = vld [vmem:[%s195_s1 + $0x8] sm:$0xff]   ;;  %vm119_vm3 = vcmask 781312  }
   0x2   :  { %139 = vmatpush3.bf16.msra.mxu0 %v148_v1  ;;  %v150_v3 = vld [vmem:[%s196_s0] sm:$0xff]  }
   0x3   :  { %140 = vmatprep.subr.bf16.mxu0 %v151_v0  ;;  %v130_v12 = vld [vmem:[%s197_s2] ss:$0 sm:$0xff] }
   0x6   :  { %141 = vmatpush3.bf16.msra.mxu0 %v149_v2 }
   0x8   :  { %v22_v4 = vld [vmem:[#allocation2] sm:$0xff]  ;;  %v23_v6 = vld [vmem:[#allocation2 + $0x8] sm:$0xff] }
   0x9   :  { %143 = vmatmul.mubr.msk.bf16.vlgmr.msra.gmra.mrb[0].mxu0 %vm47_vm2, %v150_v3 }
  0xdc   :  { %v85_v5 = vpop.f32.mrb[0].mxu0 }
  0xdd   :  { %v92_v7 = vadd.f32 %v85_v5, %v22_v4  ;;  %v144_v8 = vpop.f32.mrb[1].mxu0 }
  0xde   :  { %v88_v9 = vpop.f32.mrb[2].mxu0 }
  0xdf   :  { %95 = vst.msk [vmem:[#allocation2] sm:$0xff] %vm19_vm0, %v92_v7  ;;  %v93_v10 = vadd.f32 %v88_v9, %v23_v6  ;;  %v145_v11 = vpop.f32.mrb[3].mxu0 }
  0xe1   :  { %96 = vst.msk [vmem:[#allocation2 + $0x8] sm:$0xff] %vm19_vm0, %v93_v10 }
  0xe6   :  { %v100_v13 = vld [vmem:[#allocation2] sm:$0xff] }
  0xe7   :  { %v109_v14 = vadd.f32 %v130_v12, %v100_v13 }
  0xe8   :  { %v101_v15 = vld [vmem:[#allocation2 + $0x8] sm:$0xff] }
  0xe9   :  { %v133_v16 = vpack.c.bf16 %v109_v14, %v109_v14  ;;  %v110_v17 = vadd.f32 %v130_v12, %v101_v15 }
  0xeb   :  { %120 = vst.msk [vmem:[%s198_s3] sm:$0xf] %vm119_vm3, %v133_v16  ;;  %v134_v18 = vpack.c.bf16 %v110_v17, %v110_v17 }
  0xed   :  { %121 = vst.msk [vmem:[%s198_s3 + $0x4] sm:$0xf] %vm119_vm3, %v134_v18 }

// kernel: bengali_bert_forward.15
= control target key start
LH: loop header
LB: loop body
LE: loop exit
PB: predicated region body
PF: predicated region fallthrough
CT: control target
= control target key end

     0   :  { %vm28_vm0 = vcmask 261120   ;;  %v220_v0 = vmov 0.0   ;;  %vm221_vm1 = vmmov 0   ;;  %vm178_vm2 = vcmask 257024   ;;  %s293_s1 = inlined_call_operand.vmem [shape: bf16[32,32], index: 1, kind: input, shape index: {}]   ;;  %s294_s0 = inlined_call_operand.vmem [shape: bf16[16,32], index: 0, kind: input, shape index: {}]   ;;  %s295_s3 = inlined_call_operand.vmem [shape: bf16[16,32], index: 3, kind: input, shape index: {}]   ;;  %s296_s2 = inlined_call_operand.vmem [shape: f32[1,32], index: 2, kind: input, shape index: {}]   ;;  %s297_s4 = inlined_call_operand.vmem [shape: f32[1,32], index: 4, kind: input, shape index: {}]   ;;  %s298_s5 = inlined_call_operand.vmem [shape: f32[1,32], index: 5, kind: input, shape index: {}]   ;;  %s299_s6 = inlined_call_operand.vmem [shape: bf16[16,32], index: 6, kind: output, shape index: {}]  }
   0x1   :  { %203 = vmatprep.subr.bf16.mxu0 %v220_v0  ;;  %v213_v1 = vld [vmem:[%s293_s1] sm:$0xff]   ;;  %207 = vmatprep.mubr.msk.bf16.mxu0 %vm221_vm1, %v220_v0  ;;  %29 = vst.msk [vmem:[#allocation2] sm:$0xff] %vm28_vm0, %v220_v0  ;;  %30 = vst.msk [vmem:[#allocation2 + $0x8] sm:$0xff] %vm28_vm0, %v220_v0  ;;  %v214_v2 = vld [vmem:[%s293_s1 + $0x8] sm:$0xff]  }
   0x2   :  { %204 = vmatpush3.bf16.msra.mxu0 %v213_v1  ;;  %v215_v3 = vld [vmem:[%s294_s0] sm:$0xff]  }
   0x3   :  { %205 = vmatprep.subr.bf16.mxu0 %v220_v0  ;;  %v197_v12 = vld [vmem:[%s295_s3] sm:$0xff]  }
   0x4   :  { %v189_v13 = vld [vmem:[%s296_s2] ss:$0 sm:$0xff]  ;;  %v198_v14 = vunpack.c.l.bf16 %v197_v12  ;;  %v199_v17 = vunpack.c.h.bf16 %v197_v12 }
   0x5   :  { %v190_v41 = vld [vmem:[%s297_s4] ss:$0 sm:$0xff] }
   0x6   :  { %206 = vmatpush3.bf16.msra.mxu0 %v214_v2  ;;  %v191_v43 = vld [vmem:[%s298_s5] ss:$0 sm:$0xff] }
   0x8   :  { %v31_v4 = vld [vmem:[#allocation2] sm:$0xff]  ;;  %v32_v6 = vld [vmem:[#allocation2 + $0x8] sm:$0xff] }
   0x9   :  { %208 = vmatmul.mubr.msk.bf16.vlgmr.msra.gmra.mrb[0].mxu0 %vm28_vm0, %v215_v3 }
  0xdc   :  { %v94_v5 = vpop.f32.mrb[0].mxu0 }
  0xdd   :  { %v101_v7 = vadd.f32 %v94_v5, %v31_v4  ;;  %v209_v8 = vpop.f32.mrb[1].mxu0 }
  0xde   :  { %v97_v9 = vpop.f32.mrb[2].mxu0 }
  0xdf   :  { %103 = vst.msk [vmem:[#allocation2] sm:$0xff] %vm28_vm0, %v101_v7  ;;  %v102_v10 = vadd.f32 %v97_v9, %v32_v6  ;;  %v210_v11 = vpop.f32.mrb[3].mxu0 }
  0xe1   :  { %104 = vst.msk [vmem:[#allocation2 + $0x8] sm:$0xff] %vm28_vm0, %v102_v10 }
  0xe6   :  { %v108_v15 = vld [vmem:[#allocation2] sm:$0xff] }
  0xe7   :  { %v117_v16 = vadd.f32 %v189_v13, %v108_v15 }
  0xe8   :  { %v109_v18 = vld [vmem:[#allocation2 + $0x8] sm:$0xff] }
  0xe9   :  { %v123_v19 = vadd.f32 %v198_v14, %v117_v16  ;;  %v118_v20 = vadd.f32 %v189_v13, %v109_v18 }
  0xeb   :  { %v125_v21 = vsel %vm28_vm0, %v123_v19, 0.0  ;;  %v124_v22 = vadd.f32 %v199_v17, %v118_v20 }
  0xec   :  { %126 = vadd.xlane.f32.xlu0 %v125_v21 }
  0xed   :  { %v128_v23 = vsel %vm28_vm0, %v124_v22, 0.0 }
  0xf0   :  { %129 = vadd.xlane.f32.xlu0 %v128_v23 }
 0x179   :  { %v127_v24 = vpop.xlane.xlu0 %126 }
 0x17a   :  { %v132_v25 = vmul.f32 0.03125, %v127_v24 }
 0x17c   :  { %v134_v26 = vsub.f32 %v123_v19, %v132_v25 }
 0x17d   :  { %v130_v27 = vpop.xlane.xlu0 %129 }
 0x17e   :  { %v133_v28 = vmul.f32 0.03125, %v130_v27  ;;  %v136_v29 = vmul.f32 %v134_v26, %v134_v26 }
 0x180   :  { %v135_v30 = vsub.f32 %v124_v22, %v133_v28  ;;  %v138_v31 = vsel %vm28_vm0, %v136_v29, 0.0 }
 0x181   :  { %139 = vadd.xlane.f32.xlu1 %v138_v31 }
 0x182   :  { %v137_v32 = vmul.f32 %v135_v30, %v135_v30 }
 0x184   :  { %v141_v33 = vsel %vm28_vm0, %v137_v32, 0.0 }
 0x185   :  { %142 = vadd.xlane.f32.xlu1 %v141_v33 }
 0x20e   :  { %v140_v34 = vpop.xlane.xlu1 %139 }
 0x20f   :  { %v144_v35 = vmul.f32 0.03125, %v140_v34 }
 0x211   :  { %v146_v36 = vadd.f32 1e-12, %v144_v35 }
 0x212   :  { %v143_v37 = vpop.xlane.xlu1 %142 }
 0x213   :  { %216 = vrsqrt.f32 %v146_v36  ;;  %v145_v38 = vmul.f32 0.03125, %v143_v37 }
 0x215   :  { %v147_v39 = vadd.f32 1e-12, %v145_v38 }
 0x217   :  { %218 = vrsqrt.f32 %v147_v39 }
 0x21d   :  { %v217_v40 = vpop.eup %216 }
 0x21e   :  { %v150_v42 = vmul.f32 %v217_v40, %v134_v26 }
 0x220   :  { %v159_v44 = vmul.f32 %v190_v41, %v150_v42 }
 0x221   :  { %v219_v45 = vpop.eup %218 }
 0x222   :  { %v168_v46 = vadd.f32 %v191_v43, %v159_v44  ;;  %v151_v47 = vmul.f32 %v219_v45, %v135_v30 }
 0x224   :  { %v194_v48 = vpack.c.bf16 %v168_v46, %v168_v46  ;;  %v160_v49 = vmul.f32 %v190_v41, %v151_v47 }
 0x226   :  { %179 = vst.msk [vmem:[%s299_s6] sm:$0xf] %vm178_vm2, %v194_v48  ;;  %v169_v50 = vadd.f32 %v191_v43, %v160_v49 }
 0x228   :  { %v195_v51 = vpack.c.bf16 %v169_v50, %v169_v50 }
 0x22a   :  { %180 = vst.msk [vmem:[%s299_s6 + $0x4] sm:$0xf] %vm178_vm2, %v195_v51 }

// kernel: bengali_bert_forward.14
= control target key start
LH: loop header
LB: loop body
LE: loop exit
PB: predicated region body
PF: predicated region fallthrough
CT: control target
= control target key end

     0   :  { %s851_s9 = smov 0   ;;  %s955_s0 = inlined_call_operand.vmem [shape: bf16[2,8,96], index: 0, kind: input, shape index: {}]   ;;  %s956_s1 = inlined_call_operand.vmem [shape: f32[2,1,8], index: 1, kind: input, shape index: {}]   ;;  %s957_s2 = inlined_call_operand.vmem [shape: bf16[2,8,32], index: 2, kind: output, shape index: {}]  }
   0x1 LB: > { %s689_s10 = sadd.s32 4294967295, %s818_s9   ;;  %p693_p0 = scmp.ge.s32.totalorder %s818_s9, 1  ;;  %s818_s9 = sphi %s851_s9, %s12_s9  }
   0x2   : > { %p119_p1 = scmp.lt.s32.totalorder %s818_s9, 3 }
   0x4   : > { %p120_p2 = pnand %p693_p0, %p119_p1 }
   0x5   : > { %p142_p3 = scmp.lt.s32.totalorder (!%p120_p2), %s689_s10, 1  ;;  %v820_v0 = vmov (!%p120_p2), 0.0   ;;  %vm821_vm0 = vmmov (!%p120_p2), 0   ;;  %s822_s15 = smov (!%p120_p2), 96   ;;  %vm169_vm1 = vcmask (!%p120_p2), 64512   ;;  %v159_v5 = vlaneseq (!%p120_p2) }
   0x6   : > { %123 = sbr.rel (%p120_p2) target bundleno = 1247 (0x4df), region = 28  ;;  %723 = vmatprep.subr.bf16.mxu0 (!%p120_p2), %v820_v0  ;;  %725 = vmatprep.mubr.msk.bf16.mxu0 (!%p120_p2), %vm821_vm0, %v820_v0  ;;  %s823_s16 = smov (!%p120_p2), 64   ;;  %vm232_vm2 = vcmask (!%p120_p2), 1043456   ;;  %vm620_vm3 = vcmask (!%p120_p2), 130048   ;;  %vm622_vm4 = vcmask (!%p120_p2), 195584   ;;  %vm625_vm5 = vcmask (!%p120_p2), 257024  }
   0x7   : > { %729 = vmatprep.subr.bf16.mxu1 (!%p120_p2), %v820_v0  ;;  %731 = vmatprep.mubr.msk.bf16.mxu1 (!%p120_p2), %vm821_vm0, %v820_v0  ;;  %s824_s17 = smov (!%p120_p2), 88   ;;  %s825_s18 = smov (!%p120_p2), 120   ;;  %v160_v8 = vshrl.u32 (!%p120_p2), %v159_v5, 7 }
   0x8   : > { %s826_s19 = smov (!%p120_p2), 80   ;;  %s827_s20 = smov (!%p120_p2), 112  }
   0x9   : > { %s828_s21 = smov (!%p120_p2), 72   ;;  %s829_s22 = smov (!%p120_p2), 104   ;;  %v161_v10 = vsub.s32 (!%p120_p2), 0, %v160_v8 }
   0xa   : > { %s830_s26 = smov (!%p120_p2), 56   ;;  %s831_s27 = smov (!%p120_p2), 48  }
   0xb   : > { %s832_s28 = smov (!%p120_p2), 40   ;;  %s833_s29 = smov (!%p120_p2), 8  }
   0xc   : > { %s834_s30 = smov (!%p120_p2), 16   ;;  %s835_s3 = smov (!%p120_p2), 24  }
   0xd   : > { %s959_s10 = smov (!%p142_p3, %s689_s10), 1 }
   0xe   : > { %s694_s11 = sshll.u32 %s959_s10, 2  ;;  %s148_s25 = scalar_lea.vmem %s956_s1, %s959_s10 }
   0xf   : > { %s145_s14 = scalar_lea.vmem %s955_s0, %s694_s11  ;;  %v155_v6 = vld [vmem:[%s148_s25] sm:$0x1]  ;;  %s152_s6 = scalar_lea.vmem %s957_s2, %s694_s11 }
  0x10   : > { %v154_v1 = vld [vmem:[%s145_s14] sm:$0xf]  ;;  %v156_v7 = vsub.f32 1.0, %v155_v6 }
  0x11   : > { %v873_v2 = vcombine.low %v154_v1, %v154_v1 }
  0x12   : > { %v157_v9 = vmul.f32 -1e+09, %v156_v7 }
  0x13   : > { %167 = vrot.lane.b32.xlu0 %v873_v2, %s822_s15  ;;  %227 = vrot.lane.b32.xlu1 %v873_v2, %s823_s16 }
  0x14   : > { %v892_v11 = vrot.slane %v157_v9, %v161_v10 }
  0x17   : > { %279 = vrot.lane.b32.xlu1 %v873_v2, %s824_s17 }
  0x1b   : > { %277 = vrot.lane.b32.xlu1 %v873_v2, %s825_s18 }
  0x1f   : > { %389 = vrot.lane.b32.xlu1 %v873_v2, %s826_s19 }
  0x23   : > { %387 = vrot.lane.b32.xlu1 %v873_v2, %s827_s20 }
  0x27   : > { %499 = vrot.lane.b32.xlu1 %v873_v2, %s828_s21 }
  0x2b   : > { %497 = vrot.lane.b32.xlu1 %v873_v2, %s829_s22 }
  0x85   : > { %v168_v3 = vpop.permute.xlu0 %167  ;;  %v228_v18 = vpop.permute.xlu1 %227 }
  0x86   : > { %v174_v4 = vsel %vm169_vm1, %v168_v3, 0  ;;  %v234_v19 = vsel %vm232_vm2, %v228_v18, 0 }
  0x87   : > { %724 = vmatpush3.bf16.xpose.msra.mxu0 %v174_v4  ;;  %730 = vmatpush3.bf16.msra.mxu1 %v234_v19 }
  0x88   : > { %741 = vmatprep.subr.bf16.mxu0 %v820_v0  ;;  %735 = vmatprep.subr.bf16.mxu1 %v820_v0 }
  0x89   : > { %v280_v23 = vpop.permute.xlu1 %279 }
  0x8a   : > { %v285_v26 = vsel %vm169_vm1, %v280_v23, 0 }
  0x8d   : > { %v278_v24 = vpop.permute.xlu1 %277 }
  0x8e   : > { %726 = vmatmul.mubr.msk.bf16.vlgmr.msra.gmra.mrb[0].mxu0 %vm169_vm1, %v154_v1 }
  0x8f   : > { %743 = vmatprep.mubr.msk.bf16.mxu0 %vm821_vm0, %v820_v0 }
  0x91   : > { %v390_v28 = vpop.permute.xlu1 %389 }
  0x92   : > { %v395_v30 = vsel %vm169_vm1, %v390_v28, 0 }
  0x95   : > { %v388_v29 = vpop.permute.xlu1 %387 }
  0x99   : > { %v500_v31 = vpop.permute.xlu1 %499 }
  0x9a   : > { %v505_v32 = vsel %vm169_vm1, %v500_v31, 0 }
  0x9d   : > { %v498_v33 = vpop.permute.xlu1 %497 }
 0x161   : > { %v210_v12 = vpop.f32.mrb[0].mxu0 }
 0x162   : > { %v211_v13 = vadd.f32 %v210_v12, %v892_v11  ;;  %v727_v14 = vpop.f32.mrb[1].mxu0 }
 0x163   : > { %v213_v15 = vpop.f32.mrb[2].mxu0 }
 0x164   : > { %v728_v16 = vpop.f32.mrb[3].mxu0  ;;  %v216_v17 = vsel %vm169_vm1, %v211_v13, -inf }
 0x165   : > { %217 = vmax.xlane.f32.xlu0 %v216_v17 }
 0x17b   : > { %338 = vrot.lane.b32.xlu0 %v873_v2, %s830_s26 }
 0x1f2   : > { %v218_v20 = vpop.xlane.xlu0 %217 }
 0x1f3   : > { %v219_v21 = vsub.f32 %v211_v13, %v218_v20 }
 0x1f5   : > { %v220_v22 = vmul.f32 1.442695, %v219_v21 }
 0x1f6   : > { %v339_v34 = vpop.permute.xlu0 %338 }
 0x1f7   : > { %796 = vpow2.f32 %v220_v22  ;;  %v344_v35 = vsel %vm232_vm2, %v339_v34, 0 }
 0x1f8   : > { %742 = vmatpush3.bf16.msra.mxu0 %v344_v35 }
 0x1f9   : > { %753 = vmatprep.subr.bf16.mxu0 %v820_v0 }
 0x201   : > { %v899_v25 = vpop.eup %796 }
 0x202   : > { %v226_v27 = vpack.c.bf16 %v899_v25, %v899_v25  ;;  %v222_v17 = vsel %vm169_vm1, %v899_v25, 0.0 }
 0x204   : > { %732 = vmatmul.mubr.msk.bf16.vlgmr.msra.gmra.mrb[0].mxu1 %vm169_vm1, %v226_v27 }
 0x205   : > { %736 = vmatpush3.bf16.xpose.msra.mxu1 %v285_v26  ;;  %737 = vmatprep.mubr.msk.bf16.mxu1 %vm821_vm0, %v820_v0 }
 0x206   : > { %747 = vmatprep.subr.bf16.mxu1 %v820_v0 }
 0x20c   : > { %738 = vmatmul.mubr.msk.bf16.vlgmr.msra.gmra.mrb[4].mxu1 %vm169_vm1, %v278_v24 }
 0x20d   : > { %748 = vmatpush3.bf16.xpose.msra.mxu1 %v395_v30  ;;  %749 = vmatprep.mubr.msk.bf16.mxu1 %vm821_vm0, %v820_v0 }
 0x20e   : > { %759 = vmatprep.subr.bf16.mxu1 %v820_v0 }
 0x214   : > { %750 = vmatmul.mubr.msk.bf16.vlgmr.msra.gmra.mrb[8].mxu1 %vm169_vm1, %v388_v29 }
 0x215   : > { %760 = vmatpush3.bf16.xpose.msra.mxu1 %v505_v32  ;;  %761 = vmatprep.mubr.msk.bf16.mxu1 %vm821_vm0, %v820_v0 }
 0x21c   : > { %762 = vmatmul.mubr.msk.bf16.vlgmr.msra.gmra.mrb[12].mxu1 %vm169_vm1, %v498_v33 }
 0x2d7   : > { %v920_v36 = vpop.f32.mrb[0].mxu1 }
 0x2d8   : > { %v733_v37 = vpop.f32.mrb[1].mxu1 }
 0x2d9   : > { %v273_v38 = vpop.f32.mrb[2].mxu1 }
 0x2da   : > { %v734_v39 = vpop.f32.mrb[3].mxu1 }
 0x2df   : > { %v321_v40 = vpop.f32.mrb[4].mxu1 }
 0x2e0   : > { %v322_v41 = vadd.f32 %v321_v40, %v892_v11  ;;  %v739_v42 = vpop.f32.mrb[5].mxu1 }
 0x2e1   : > { %v324_v43 = vpop.f32.mrb[6].mxu1 }
 0x2e2   : > { %v740_v44 = vpop.f32.mrb[7].mxu1  ;;  %v327_v45 = vsel %vm169_vm1, %v322_v41, -inf }
 0x2e3   : > { %328 = vmax.xlane.f32.xlu1 %v327_v45 }
 0x2e7   : > { %v431_v46 = vpop.f32.mrb[8].mxu1 }
 0x2e8   : > { %v432_v47 = vadd.f32 %v431_v46, %v892_v11  ;;  %v751_v48 = vpop.f32.mrb[9].mxu1 }
 0x2e9   : > { %v434_v49 = vpop.f32.mrb[10].mxu1 }
 0x2ea   : > { %v752_v50 = vpop.f32.mrb[11].mxu1  ;;  %v437_v51 = vsel %vm169_vm1, %v432_v47, -inf }
 0x2eb   : > { %438 = vmax.xlane.f32.xlu0 %v437_v51 }
 0x2ef   : > { %v541_v52 = vpop.f32.mrb[12].mxu1 }
 0x2f0   : > { %v542_v53 = vadd.f32 %v541_v52, %v892_v11  ;;  %v763_v54 = vpop.f32.mrb[13].mxu1 }
 0x2f1   : > { %v544_v55 = vpop.f32.mrb[14].mxu1 }
 0x2f2   : > { %v764_v56 = vpop.f32.mrb[15].mxu1  ;;  %v547_v57 = vsel %vm169_vm1, %v542_v53, -inf }
 0x2f3   : > { %548 = vmax.xlane.f32.xlu0 %v547_v57 }
 0x2f4   : > { %448 = vrot.lane.b32.xlu1 %v873_v2, %s831_s27 }
 0x309   : > { %558 = vrot.lane.b32.xlu0 %v873_v2, %s832_s28 }
 0x370   : > { %v329_v58 = vpop.xlane.xlu1 %328 }
 0x371   : > { %v330_v59 = vsub.f32 %v322_v41, %v329_v58 }
 0x373   : > { %v331_v60 = vmul.f32 1.442695, %v330_v59 }
 0x374   : > { %v449_v1 = vpop.permute.xlu1 %448 }
 0x375   : > { %798 = vpow2.f32 %v331_v60  ;;  %v454_v4 = vsel %vm232_vm2, %v449_v1, 0 }
 0x378   : > { %v439_v61 = vpop.xlane.xlu0 %438 }
 0x379   : > { %v440_v62 = vsub.f32 %v432_v47, %v439_v61 }
 0x37b   : > { %v441_v63 = vmul.f32 1.442695, %v440_v62 }
 0x37d   : > { %800 = vpow2.f32 %v441_v63 }
 0x37f   : > { %v799_v3 = vpop.eup %798 }
 0x380   : > { %v549_v5 = vpop.xlane.xlu0 %548  ;;  %v333_v6 = vsel %vm169_vm1, %v799_v3, 0.0  ;;  %v337_v7 = vpack.c.bf16 %v799_v3, %v799_v3 }
 0x381   : > { %v550_v8 = vsub.f32 %v542_v53, %v549_v5  ;;  %334 = vadd.xlane.f32.xlu0 %v333_v6 }
 0x382   : > { %744 = vmatmul.mubr.msk.bf16.vlgmr.msra.gmra.mrb[4].mxu0 %vm169_vm1, %v337_v7 }
 0x383   : > { %v551_v2 = vmul.f32 1.442695, %v550_v8  ;;  %754 = vmatpush3.bf16.msra.mxu0 %v454_v4  ;;  %755 = vmatprep.mubr.msk.bf16.mxu0 %vm821_vm0, %v820_v0 }
 0x384   : > { %765 = vmatprep.subr.bf16.mxu0 %v820_v0  ;;  %v559_v9 = vpop.permute.xlu0 %558 }
 0x385   : > { %802 = vpow2.f32 %v551_v2  ;;  %v564_v11 = vsel %vm232_vm2, %v559_v9, 0 }
 0x387   : > { %v801_v10 = vpop.eup %800 }
 0x388   : > { %v443_v12 = vsel %vm169_vm1, %v801_v10, 0.0  ;;  %v447_v13 = vpack.c.bf16 %v801_v10, %v801_v10 }
 0x389   : > { %444 = vadd.xlane.f32.xlu1 %v443_v12 }
 0x38a   : > { %756 = vmatmul.mubr.msk.bf16.vlgmr.msra.gmra.mrb[8].mxu0 %vm169_vm1, %v447_v13 }
 0x38b   : > { %766 = vmatpush3.bf16.msra.mxu0 %v564_v11  ;;  %767 = vmatprep.mubr.msk.bf16.mxu0 %vm821_vm0, %v820_v0 }
 0x38f   : > { %v803_v14 = vpop.eup %802 }
 0x390   : > { %v553_v15 = vsel %vm169_vm1, %v803_v14, 0.0  ;;  %v557_v16 = vpack.c.bf16 %v803_v14, %v803_v14 }
 0x391   : > { %554 = vadd.xlane.f32.xlu0 %v553_v15 }
 0x392   : > { %768 = vmatmul.mubr.msk.bf16.vlgmr.msra.gmra.mrb[12].mxu0 %vm169_vm1, %v557_v16 }
 0x395   : > { %223 = vadd.xlane.f32.xlu0 %v222_v17 }
 0x40e   : > { %v335_v18 = vpop.xlane.xlu0 %334 }
 0x40f   : > { %804 = vrcp.f32 %v335_v18 }
 0x416   : > { %v445_v19 = vpop.xlane.xlu1 %444 }
 0x417   : > { %806 = vrcp.f32 %v445_v19 }
 0x419   : > { %v805_v20 = vpop.eup %804 }
 0x41e   : > { %v555_v24 = vpop.xlane.xlu0 %554 }
 0x41f   : > { %808 = vrcp.f32 %v555_v24 }
 0x421   : > { %v807_v27 = vpop.eup %806 }
 0x422   : > { %v224_v39 = vpop.xlane.xlu0 %223 }
 0x423   : > { %810 = vrcp.f32 %v224_v39 }
 0x429   : > { %v809_v32 = vpop.eup %808 }
 0x42d   : > { %v811_v40 = vpop.eup %810 }
 0x42e   : > { %v276_v42 = vmul.f32 %v811_v40, %v920_v36 }
 0x455   : > { %v380_v21 = vpop.f32.mrb[4].mxu0 }
 0x456   : > { %v386_v22 = vmul.f32 %v805_v20, %v380_v21  ;;  %v745_v23 = vpop.f32.mrb[5].mxu0 }
 0x457   : > { %v383_v0 = vpop.f32.mrb[6].mxu0 }
 0x458   : > { %608 = vrot.lane.b32.xlu0 %v386_v22, %s833_s29  ;;  %v746_v26 = vpop.f32.mrb[7].mxu0 }
 0x45d   : > { %v490_v28 = vpop.f32.mrb[8].mxu0 }
 0x45e   : > { %v496_v29 = vmul.f32 %v807_v27, %v490_v28  ;;  %v757_v30 = vpop.f32.mrb[9].mxu0 }
 0x45f   : > { %v493_v25 = vpop.f32.mrb[10].mxu0 }
 0x460   : > { %612 = vrot.lane.b32.xlu1 %v496_v29, %s834_s30  ;;  %v758_v31 = vpop.f32.mrb[11].mxu0 }
 0x465   : > { %v600_v33 = vpop.f32.mrb[12].mxu0 }
 0x466   : > { %v606_v34 = vmul.f32 %v809_v32, %v600_v33  ;;  %v769_v35 = vpop.f32.mrb[13].mxu0 }
 0x467   : > { %v603_v37 = vpop.f32.mrb[14].mxu0 }
 0x468   : > { %616 = vrot.lane.b32.xlu0 %v606_v34, %s835_s3  ;;  %v770_v38 = vpop.f32.mrb[15].mxu0 }
 0x4ca   : > { %v609_v41 = vpop.permute.xlu0 %608 }
 0x4cb   : > { %v619_v44 = vsel %vm169_vm1, %v276_v42, %v609_v41 }
 0x4d2   : > { %v613_v43 = vpop.permute.xlu1 %612 }
 0x4d3   : > { %v621_v45 = vsel %vm620_vm3, %v619_v44, %v613_v43 }
 0x4da   : > { %v617_v46 = vpop.permute.xlu0 %616 }
 0x4db   : > { %v623_v47 = vsel %vm622_vm4, %v621_v45, %v617_v46 }
 0x4dc   : > { %v624_v48 = vpack.c.bf16 %v623_v47, %v623_v47 }
 0x4de   : > { %626 = vst.msk [vmem:[%s152_s6] sm:$0xf] %vm625_vm5, %v624_v48 }
 0x4df PF: > { %s12_s9 = sadd.s32 1, %s818_s9  }
 0x4e0   : > { %p9_p4 = scmp.ge.s32.totalorder %s12_s9, 4  }
 0x4e2   :  { %11 = sbr.rel (!%p9_p4) target bundleno = 1 (0x1), region = 61 }

// kernel: bengali_bert_forward.16
= control target key start
LH: loop header
LB: loop body
LE: loop exit
PB: predicated region body
PF: predicated region fallthrough
CT: control target
= control target key end

     0   :  { %vm19_vm0 = vcmask 523264   ;;  %v173_v0 = vmov 0.0   ;;  %vm174_vm1 = vmmov 0   ;;  %vm47_vm2 = vcmask 261120   ;;  %s217_s1 = inlined_call_operand.vmem [shape: bf16[32,64], index: 1, kind: input, shape index: {}]   ;;  %s218_s0 = inlined_call_operand.vmem [shape: bf16[16,32], index: 0, kind: input, shape index: {}]   ;;  %s219_s2 = inlined_call_operand.vmem [shape: f32[1,64], index: 2, kind: input, shape index: {}]   ;;  %s220_s3 = inlined_call_operand.vmem [shape: bf16[16,64], index: 3, kind: output, shape index: {}]  }
   0x1   :  { %156 = vmatprep.subr.bf16.mxu0 %v173_v0  ;;  %v166_v1 = vld [vmem:[%s217_s1] sm:$0xff]   ;;  %160 = vmatprep.mubr.msk.bf16.mxu0 %vm174_vm1, %v173_v0  ;;  %20 = vst.msk [vmem:[#allocation2] sm:$0xff] %vm19_vm0, %v173_v0  ;;  %21 = vst.msk [vmem:[#allocation2 + $0x8] sm:$0xff] %vm19_vm0, %v173_v0  ;;  %v167_v2 = vld [vmem:[%s217_s1 + $0x8] sm:$0xff]   ;;  %vm137_vm3 = vcmask 519168  }
   0x2   :  { %157 = vmatpush3.bf16.msra.mxu0 %v166_v1  ;;  %v168_v3 = vld [vmem:[%s218_s0] sm:$0xff]  }
   0x3   :  { %158 = vmatprep.subr.bf16.mxu0 %v173_v0  ;;  %v148_v12 = vld [vmem:[%s219_s2] ss:$0 sm:$0xff] }
   0x6   :  { %159 = vmatpush3.bf16.msra.mxu0 %v167_v2 }
   0x8   :  { %v22_v4 = vld [vmem:[#allocation2] sm:$0xff]  ;;  %v23_v6 = vld [vmem:[#allocation2 + $0x8] sm:$0xff] }
   0x9   :  { %161 = vmatmul.mubr.msk.bf16.vlgmr.msra.gmra.mrb[0].mxu0 %vm47_vm2, %v168_v3 }
  0xdc   :  { %v85_v5 = vpop.f32.mrb[0].mxu0 }
  0xdd   :  { %v92_v7 = vadd.f32 %v85_v5, %v22_v4  ;;  %v162_v8 = vpop.f32.mrb[1].mxu0 }
  0xde   :  { %v88_v9 = vpop.f32.mrb[2].mxu0 }
  0xdf   :  { %95 = vst.msk [vmem:[#allocation2] sm:$0xff] %vm19_vm0, %v92_v7  ;;  %v93_v10 = vadd.f32 %v88_v9, %v23_v6  ;;  %v163_v11 = vpop.f32.mrb[3].mxu0 }
  0xe1   :  { %96 = vst.msk [vmem:[#allocation2 + $0x8] sm:$0xff] %vm19_vm0, %v93_v10 }
  0xe6   :  { %v100_v13 = vld [vmem:[#allocation2] sm:$0xff] }
  0xe7   :  { %v109_v14 = vadd.f32 %v148_v12, %v100_v13 }
  0xe8   :  { %v101_v15 = vld [vmem:[#allocation2 + $0x8] sm:$0xff] }
  0xe9   :  { %v113_v16 = vmul.f32 0.044715, %v109_v14  ;;  %v110_v17 = vadd.f32 %v148_v12, %v101_v15  ;;  %v111_v28 = vmul.f32 0.5, %v109_v14 }
  0xeb   :  { %v115_v18 = vmul.f32 %v113_v16, %v109_v14  ;;  %v114_v19 = vmul.f32 0.044715, %v110_v17  ;;  %v112_v32 = vmul.f32 0.5, %v110_v17 }
  0xed   :  { %v117_v20 = vmul.f32 %v115_v18, %v109_v14  ;;  %v116_v21 = vmul.f32 %v114_v19, %v110_v17 }
  0xef   :  { %v119_v22 = vadd.f32 %v117_v20, %v109_v14  ;;  %v118_v23 = vmul.f32 %v116_v21, %v110_v17 }
  0xf1   :  { %v121_v24 = vmul.f32 0.7978846, %v119_v22  ;;  %v120_v25 = vadd.f32 %v118_v23, %v110_v17 }
  0xf3   :  { %169 = vtanh.f32 %v121_v24  ;;  %v122_v26 = vmul.f32 0.7978846, %v120_v25 }
  0xf5   :  { %171 = vtanh.f32 %v122_v26 }
  0xfd   :  { %v170_v27 = vpop.eup %169 }
  0xfe   :  { %v125_v29 = vadd.f32 1.0, %v170_v27 }
  0xff   :  { %v172_v30 = vpop.eup %171 }
 0x100   :  { %v127_v31 = vmul.f32 %v125_v29, %v111_v28  ;;  %v126_v33 = vadd.f32 1.0, %v172_v30 }
 0x102   :  { %v151_v34 = vpack.c.bf16 %v127_v31, %v127_v31  ;;  %v128_v35 = vmul.f32 %v126_v33, %v112_v32 }
 0x104   :  { %138 = vst.msk [vmem:[%s220_s3] sm:$0xf] %vm137_vm3, %v151_v34  ;;  %v152_v36 = vpack.c.bf16 %v128_v35, %v128_v35 }
 0x106   :  { %139 = vst.msk [vmem:[%s220_s3 + $0x4] sm:$0xf] %vm137_vm3, %v152_v36 }

// kernel: bengali_bert_forward.17
= control target key start
LH: loop header
LB: loop body
LE: loop exit
PB: predicated region body
PF: predicated region fallthrough
CT: control target
= control target key end

     0   :  { %vm28_vm0 = vcmask 261120   ;;  %v247_v0 = vmov 0.0   ;;  %vm248_vm1 = vmmov 0   ;;  %vm72_vm2 = vcmask 523264   ;;  %s325_s1 = inlined_call_operand.vmem [shape: bf16[64,32], index: 1, kind: input, shape index: {}]   ;;  %s326_s0 = inlined_call_operand.vmem [shape: bf16[16,64], index: 0, kind: input, shape index: {}]   ;;  %s327_s3 = inlined_call_operand.vmem [shape: bf16[16,32], index: 3, kind: input, shape index: {}]   ;;  %s328_s2 = inlined_call_operand.vmem [shape: f32[1,32], index: 2, kind: input, shape index: {}]   ;;  %s329_s4 = inlined_call_operand.vmem [shape: f32[1,32], index: 4, kind: input, shape index: {}]   ;;  %s330_s5 = inlined_call_operand.vmem [shape: f32[1,32], index: 5, kind: input, shape index: {}]   ;;  %s331_s6 = inlined_call_operand.vmem [shape: bf16[16,32], index: 6, kind: output, shape index: {}]  }
   0x1   :  { %224 = vmatprep.subr.bf16.mxu0 %v247_v0  ;;  %v238_v1 = vld [vmem:[%s325_s1] sm:$0xff]   ;;  %232 = vmatprep.mubr.msk.bf16.mxu0 %vm248_vm1, %v247_v0  ;;  %29 = vst.msk [vmem:[#allocation2] sm:$0xff] %vm28_vm0, %v247_v0  ;;  %30 = vst.msk [vmem:[#allocation2 + $0x8] sm:$0xff] %vm28_vm0, %v247_v0  ;;  %v239_v2 = vld [vmem:[%s325_s1 + $0x8] sm:$0xff]   ;;  %vm195_vm3 = vcmask 257024  }
   0x2   :  { %225 = vmatpush3.bf16.msra.mxu0 %v238_v1  ;;  %v240_v3 = vld [vmem:[%s325_s1 + $0x10] sm:$0xff]   ;;  %v241_v4 = vld [vmem:[%s325_s1 + $0x18] sm:$0xff]   ;;  %v242_v5 = vld [vmem:[%s326_s0] sm:$0xff]  }
   0x3   :  { %226 = vmatprep.subr.bf16.mxu0 %v247_v0  ;;  %v216_v14 = vld [vmem:[%s327_s3] sm:$0xff]  }
   0x4   :  { %v208_v15 = vld [vmem:[%s328_s2] ss:$0 sm:$0xff]  ;;  %v217_v16 = vunpack.c.l.bf16 %v216_v14  ;;  %v218_v19 = vunpack.c.h.bf16 %v216_v14 }
   0x5   :  { %v209_v43 = vld [vmem:[%s329_s4] ss:$0 sm:$0xff] }
   0x6   :  { %227 = vmatpush3.bf16.msra.mxu0 %v239_v2  ;;  %v210_v45 = vld [vmem:[%s330_s5] ss:$0 sm:$0xff] }
   0x7   :  { %228 = vmatprep.subr.bf16.mxu0 %v247_v0 }
   0x8   :  { %v31_v6 = vld [vmem:[#allocation2] sm:$0xff]  ;;  %v32_v8 = vld [vmem:[#allocation2 + $0x8] sm:$0xff] }
   0xa   :  { %229 = vmatpush3.bf16.msra.mxu0 %v240_v3 }
   0xb   :  { %230 = vmatprep.subr.bf16.mxu0 %v247_v0 }
   0xe   :  { %231 = vmatpush3.bf16.msra.mxu0 %v241_v4 }
  0x11   :  { %233 = vmatmul.mubr.msk.bf16.vlgmr.msra.gmra.mrb[0].mxu0 %vm72_vm2, %v242_v5 }
  0xe4   :  { %v110_v7 = vpop.f32.mrb[0].mxu0 }
  0xe5   :  { %v117_v9 = vadd.f32 %v110_v7, %v31_v6  ;;  %v234_v10 = vpop.f32.mrb[1].mxu0 }
  0xe6   :  { %v113_v11 = vpop.f32.mrb[2].mxu0 }
  0xe7   :  { %120 = vst.msk [vmem:[#allocation2] sm:$0xff] %vm28_vm0, %v117_v9  ;;  %v118_v12 = vadd.f32 %v113_v11, %v32_v8  ;;  %v235_v13 = vpop.f32.mrb[3].mxu0 }
  0xe9   :  { %121 = vst.msk [vmem:[#allocation2 + $0x8] sm:$0xff] %vm28_vm0, %v118_v12 }
  0xee   :  { %v125_v17 = vld [vmem:[#allocation2] sm:$0xff] }
  0xef   :  { %v134_v18 = vadd.f32 %v208_v15, %v125_v17 }
  0xf0   :  { %v126_v20 = vld [vmem:[#allocation2 + $0x8] sm:$0xff] }
  0xf1   :  { %v140_v21 = vadd.f32 %v217_v16, %v134_v18  ;;  %v135_v22 = vadd.f32 %v208_v15, %v126_v20 }
  0xf3   :  { %v142_v23 = vsel %vm28_vm0, %v140_v21, 0.0  ;;  %v141_v24 = vadd.f32 %v218_v19, %v135_v22 }
  0xf4   :  { %143 = vadd.xlane.f32.xlu0 %v142_v23 }
  0xf5   :  { %v145_v25 = vsel %vm28_vm0, %v141_v24, 0.0 }
  0xf8   :  { %146 = vadd.xlane.f32.xlu0 %v145_v25 }
 0x181   :  { %v144_v26 = vpop.xlane.xlu0 %143 }
 0x182   :  { %v149_v27 = vmul.f32 0.03125, %v144_v26 }
 0x184   :  { %v151_v28 = vsub.f32 %v140_v21, %v149_v27 }
 0x185   :  { %v147_v29 = vpop.xlane.xlu0 %146 }
 0x186   :  { %v150_v30 = vmul.f32 0.03125, %v147_v29  ;;  %v153_v31 = vmul.f32 %v151_v28, %v151_v28 }
 0x188   :  { %v152_v32 = vsub.f32 %v141_v24, %v150_v30  ;;  %v155_v33 = vsel %vm28_vm0, %v153_v31, 0.0 }
 0x189   :  { %156 = vadd.xlane.f32.xlu1 %v155_v33 }
 0x18a   :  { %v154_v34 = vmul.f32 %v152_v32, %v152_v32 }
 0x18c   :  { %v158_v35 = vsel %vm28_vm0, %v154_v34, 0.0 }
 0x18d   :  { %159 = vadd.xlane.f32.xlu1 %v158_v35 }
 0x216   :  { %v157_v36 = vpop.xlane.xlu1 %156 }
 0x217   :  { %v161_v37 = vmul.f32 0.03125, %v157_v36 }
 0x219   :  { %v163_v38 = vadd.f32 1e-12, %v161_v37 }
 0x21a   :  { %v160_v39 = vpop.xlane.xlu1 %159 }
 0x21b   :  { %243 = vrsqrt.f32 %v163_v38  ;;  %v162_v40 = vmul.f32 0.03125, %v160_v39 }
 0x21d   :  { %v164_v41 = vadd.f32 1e-12, %v162_v40 }
 0x21f   :  { %245 = vrsqrt.f32 %v164_v41 }
 0x225   :  { %v244_v42 = vpop.eup %243 }
 0x226   :  { %v167_v44 = vmul.f32 %v244_v42, %v151_v28 }
 0x228   :  { %v176_v46 = vmul.f32 %v209_v43, %v167_v44 }
 0x229   :  { %v246_v47 = vpop.eup %245 }
 0x22a   :  { %v185_v48 = vadd.f32 %v210_v45, %v176_v46  ;;  %v168_v49 = vmul.f32 %v246_v47, %v152_v32 }
 0x22c   :  { %v213_v50 = vpack.c.bf16 %v185_v48, %v185_v48  ;;  %v177_v51 = vmul.f32 %v209_v43, %v168_v49 }
 0x22e   :  { %196 = vst.msk [vmem:[%s331_s6] sm:$0xf] %vm195_vm3, %v213_v50  ;;  %v186_v52 = vadd.f32 %v210_v45, %v177_v51 }
 0x230   :  { %v214_v53 = vpack.c.bf16 %v186_v52, %v186_v52 }
 0x232   :  { %197 = vst.msk [vmem:[%s331_s6 + $0x4] sm:$0xf] %vm195_vm3, %v214_v53 }

// kernel: bengali_bert_forward.23
= control target key start
LH: loop header
LB: loop body
LE: loop exit
PB: predicated region body
PF: predicated region fallthrough
CT: control target
= control target key end

     0   :  { %v158_v1 = vmov 0.0   ;;  %vm159_vm0 = vmmov 0   ;;  %vm20_vm1 = vcmask 17408   ;;  %s208_s0 = inlined_call_operand.vmem [shape: bf16[2,32], index: 0, kind: input, shape index: {}]   ;;  %s209_s1 = inlined_call_operand.vmem [shape: bf16[32,3], index: 1, kind: input, shape index: {}]   ;;  %s210_s2 = inlined_call_operand.vmem [shape: f32[1,3], index: 2, kind: input, shape index: {}]   ;;  %s211_s3 = inlined_call_operand.hbm [shape: f32[2,3], index: 3, kind: output, shape index: {}]  }
   0x1   :  { %v132_v0 = vld [vmem:[%s209_s1] sm:$0xff]   ;;  %121 = vmatprep.subr.bf16.mxu0 %v158_v1  ;;  %v133_v2 = vld [vmem:[%s209_s1 + $0x8] sm:$0xff]   ;;  %125 = vmatprep.mubr.msk.bf16.mxu0 %vm159_vm0, %v158_v1 }
   0x2   :  { %122 = vmatpush3.bf16.msra.mxu0 %v132_v0 }
   0x3   :  { %8 = vsyncpa [#allocation4], 0  ;;  %123 = vmatprep.subr.bf16.mxu0 %v158_v1  ;;  %21 = vst.msk [vmem:[#allocation2] sm:$0x3] %vm20_vm1, %v158_v1  ;;  %v23_v3 = vld [vmem:[%s208_s0] sm:$0x1] }
   0x4   :  { %vm40_vm2 = vcmask 261120   ;;  %v117_v10 = vld [vmem:[%s210_s2] ss:$0 sm:$0xff]  ;;  %s160_s19 = smov [#allocation3]  }
   0x5   :  { %s106_s20 = sshll.u32 %s160_s19, 4  ;;  %s107_s20 = int_to_ptr.vmem [resolvable:$true] %s106_s20 }
   0x6   :  { %124 = vmatpush3.bf16.msra.mxu0 %v133_v2  ;;  %s134_s0 = scalar_lea.vmem %s107_s20, 32  ;;  %p139_p1 = scmp.lt.s32.totalorder %s107_s20, %s107_s20 }
   0x7   :  { %p135_p0 = scmp.ne.s32.totalorder %s107_s20, %s134_s0  ;;  %p140_p2 = scmp.lt.s32.totalorder %s134_s0, %s134_s0 }
   0x9   :  { %126 = vmatmul.mubr.msk.bf16.vlgmr.msra.gmra.mrb[0].mxu0 %vm40_vm2, %v23_v3  ;;  %p141_p3 = por %p140_p2, %p139_p1 }
   0xa   :  { %v22_v4 = vld [vmem:[#allocation2] sm:$0x3] }
   0xb   :  { %p142_p4 = pnand %p141_p3, %p135_p0 }
  0xdc   :  { %v78_v5 = vpop.f32.mrb[0].mxu0 }
  0xdd   :  { %v84_v6 = vadd.f32 %v78_v5, %v22_v4  ;;  %v127_v7 = vpop.f32.mrb[1].mxu0 }
  0xde   :  { %v81_v8 = vpop.f32.mrb[2].mxu0 }
  0xdf   :  { %86 = vst.msk [vmem:[#allocation2] sm:$0x3] %vm20_vm1, %v84_v6  ;;  %v128_v9 = vpop.f32.mrb[3].mxu0 }
  0xe6   :  { %v90_v11 = vld [vmem:[#allocation2] sm:$0x3] }
  0xe7   :  { %v98_v12 = vadd.f32 %v117_v10, %v90_v11 }
  0xe9   :  { %99 = vst.msk [vmem:[#allocation3] sm:$0x3] %vm20_vm1, %v98_v12 }
  0xea   :  { %145 = shalt.err (!%p142_p4)
}
  0xeb   :  { %s146_s23 = scalar_lea.hbm %s211_s3, 32 }
  0xec   :  { %p147_p5 = scmp.ne.s32.totalorder %s211_s3, %s146_s23  ;;  %p150_p6 = scmp.lt.u32.totalorder %s146_s23, %s211_s3 }
  0xee   :  { %p152_p7 = pnand %p150_p6, %p147_p5 }
  0xf0   :  { %155 = shalt.err (!%p152_p7)
}
  0xf1   :  { %109 = dma.vmem_to_hbm [thread:$0]  %s107_s20, 32, %s211_s3, [#allocation4]  }
  0xf2   :  { %156 = dma.done.wait [#allocation4], 32  }
  0xf3   :  { %157 = vsyncadd [#allocation4], 4294967264 }
  0xf4   :  { %113 = vsyncpa [#allocation4], 1 }

</bundles_post_ra>
